<compile_context>
chip_gen: v7x
topology: tpu7x:2x2x1
jax: 0.10.0
libtpu: 0.0.40
codegen_flags: <defaults>
</compile_context>

<pallas_src>
import functools

import jax
import jax.numpy as jnp
from jax import lax
from jax.experimental import pallas as pl
from jax.experimental.pallas import tpu as pltpu

Z1_DIM = 20          # z1_dim default of iLVAE
Z2_DIM = 10          # z2_dim default of iLVAE
N_ITERS = 20         # n_iters default of iLVAE
BATCH = 8            # small batch, sublane aligned
OUT_LANES = 128      # lane-dense packed output slab width


def _softplus(x):
    # numerically-stable softplus usable both inside and outside the kernel
    return jnp.maximum(x, 0.0) + jnp.log1p(jnp.exp(-jnp.abs(x)))


# -----------------------------------------------------------------------------
# Pallas kernel: the forward "hot path" that initializes PHI
#   encoder1 -> encoder2 -> reparameterized z2 sample -> decoder2
#   -> precision_weighted  ==>  packed (mu_e1, logvar_e1, mu_e2, logvar_e2)
# Single grid-less invocation; everything resident in VMEM.
# -----------------------------------------------------------------------------
def ilvae_init_kernel(x_ref, eps2_ref,
                      w_e1fc1, b_e1fc1, w_e1fc2, b_e1fc2, w_e1h, b_e1h,
                      w_e2fc1, b_e2fc1, w_e2fc2, b_e2fc2, w_e2h, b_e2h,
                      w_d2fc1, b_d2fc1, w_d2fc2, b_d2fc2, w_d2h, b_d2h,
                      out_ref):

    def lin(h, w_ref, b_ref):
        w = w_ref[...]
        # bf16 dot inputs where the weight is bf16; f32 accumulation / output.
        return jnp.dot(h.astype(w.dtype), w,
                       preferred_element_type=jnp.float32) + b_ref[...]

    x = x_ref[...]

    # encoder1
    h = jnp.tanh(lin(x, w_e1fc1, b_e1fc1))
    h = jnp.tanh(lin(h, w_e1fc2, b_e1fc2))
    e1_heads = lin(h, w_e1h, b_e1h)                       # fused e1fc4|e1fc5
    mu1 = e1_heads[:, :Z1_DIM]
    logvar1 = jnp.log(_softplus(e1_heads[:, Z1_DIM:]) + 1e-8)

    # encoder2 (takes the tanh(e1fc2) features `h`)
    g = jnp.tanh(lin(h, w_e2fc1, b_e2fc1))
    g = jnp.tanh(lin(g, w_e2fc2, b_e2fc2))
    e2_heads = lin(g, w_e2h, b_e2h)                       # fused e2fc4|e2fc5
    mu2 = e2_heads[:, :Z2_DIM]
    logvar2 = jnp.log(_softplus(e2_heads[:, Z2_DIM:]) + 1e-8)

    # r_sampling(mu2, logvar2) with externally supplied epsilon
    z2 = jnp.exp(0.5 * logvar2) * eps2_ref[...] + mu2

    # decoder2
    d = jnp.tanh(lin(z2, w_d2fc1, b_d2fc1))
    d = jnp.tanh(lin(d, w_d2fc2, b_d2fc2))
    d2_heads = lin(d, w_d2h, b_d2h)                       # fused d2fc4|d2fc5
    d_mu1 = d2_heads[:, :Z1_DIM]
    d_logvar1 = jnp.log(_softplus(d2_heads[:, Z1_DIM:]) + 1e-8)

    # precision_weighted(mu1, logvar1, d_mu1, d_logvar1), numerically stable:
    #   p_i = exp(-logvar_i); use softmax-style weights and
    #   logvar_new = -logaddexp(-logvar1, -d_logvar1)
    n1 = -logvar1
    n2 = -d_logvar1
    nmax = jnp.maximum(n1, n2)
    w1 = jnp.exp(n1 - nmax)
    w2 = jnp.exp(n2 - nmax)
    denom = w1 + w2
    inv_denom = pl.reciprocal(denom, approx=True)
    mu_new = (mu1 * w1 + d_mu1 * w2) * inv_denom
    logvar_new = -(nmax + jnp.log(denom))

    # single lane-dense output slab: [mu_e1 | logvar_e1 | mu_e2 | logvar_e2 | pad]
    out_ref[...] = jnp.zeros(out_ref.shape, out_ref.dtype)
    out_ref[:, 0:Z1_DIM] = mu_new
    out_ref[:, Z1_DIM:2 * Z1_DIM] = logvar_new
    out_ref[:, 2 * Z1_DIM:2 * Z1_DIM + Z2_DIM] = mu2
    out_ref[:, 2 * Z1_DIM + Z2_DIM:2 * Z1_DIM + 2 * Z2_DIM] = logvar2


def _pack_kernel_weights(params):
    """Cast large weights to bf16 and fuse the paired head weights (host side)."""
    bf16 = lambda w: w.astype(jnp.bfloat16)
    w_e1h = jnp.concatenate([params["e1fc4_w"], params["e1fc5_w"]], axis=1)
    b_e1h = jnp.concatenate([params["e1fc4_b"], params["e1fc5_b"]], axis=1)
    w_e2h = jnp.concatenate([params["e2fc4_w"], params["e2fc5_w"]], axis=1)
    b_e2h = jnp.concatenate([params["e2fc4_b"], params["e2fc5_b"]], axis=1)
    w_d2h = jnp.concatenate([params["d2fc4_w"], params["d2fc5_w"]], axis=1)
    b_d2h = jnp.concatenate([params["d2fc4_b"], params["d2fc5_b"]], axis=1)
    return [
        bf16(params["e1fc1_w"]), params["e1fc1_b"],
        bf16(params["e1fc2_w"]), params["e1fc2_b"],
        w_e1h, b_e1h,                                   # tiny heads stay f32
        bf16(params["e2fc1_w"]), params["e2fc1_b"],
        bf16(params["e2fc2_w"]), params["e2fc2_b"],
        w_e2h, b_e2h,
        bf16(params["d2fc1_w"]), params["d2fc1_b"],
        bf16(params["d2fc2_w"]), params["d2fc2_b"],
        w_d2h, b_d2h,
    ]


def ilvae_forward_init(x, eps2, params):
    """Pallas kernel producing PHI's initial variational params (4-tuple)."""
    b = x.shape[0]
    flat = _pack_kernel_weights(params)
    vmem_spec = pl.BlockSpec(memory_space=pltpu.MemorySpace.VMEM)
    slab = pl.pallas_call(
        ilvae_init_kernel,
        out_shape=jax.ShapeDtypeStruct((b, OUT_LANES), jnp.float32),
        in_specs=[vmem_spec] * (2 + len(flat)),
        out_specs=vmem_spec,
    )(x, eps2, *flat)
    mu_e1 = slab[:, 0:Z1_DIM]
    logvar_e1 = slab[:, Z1_DIM:2 * Z1_DIM]
    mu_e2 = slab[:, 2 * Z1_DIM:2 * Z1_DIM + Z2_DIM]
    logvar_e2 = slab[:, 2 * Z1_DIM + Z2_DIM:2 * Z1_DIM + 2 * Z2_DIM]
    return mu_e1, logvar_e1, mu_e2, logvar_e2


# -----------------------------------------------------------------------------
# Plain-JAX replicas used only by the in-forward iterative (Adam) inference
# loop, which needs reverse-mode autodiff through the decoder.
# TODO(synk): the per-iteration autograd + Adam refinement of PHI stays in
# plain JAX (jax.grad inside one jitted lax.fori_loop); only the forward init
# hot path is a Pallas kernel.
# -----------------------------------------------------------------------------
def _lin(h, p, name):
    return jnp.dot(h, p[name + "_w"],
                   preferred_element_type=jnp.float32) + p[name + "_b"]


def decoder2_jax(z2, p):
    h = jnp.tanh(_lin(z2, p, "d2fc1"))
    h = jnp.tanh(_lin(h, p, "d2fc2"))
    d_mu1 = _lin(h, p, "d2fc4")
    d_logvar1 = jnp.log(_softplus(_lin(h, p, "d2fc5")) + 1e-8)
    return d_mu1, d_logvar1


def decoder1_jax(z1, p):
    h = jnp.tanh(_lin(z1, p, "d1fc1"))
    h = jnp.tanh(_lin(h, p, "d1fc2"))
    return _lin(h, p, "d1fc4")


def hvae_loss_jax(x, x_rec, z2_vp, z1_vp, d_z1_vp):
    rec = jnp.sum((x_rec - x) ** 2)                      # mse_loss(reduction='sum')
    mu2, logvar2, eps2 = z2_vp
    mu1, logvar1, eps1 = z1_vp
    d_mu1, d_logvar1, _ = d_z1_vp
    log_q_z1_x = jnp.sum(-0.5 * eps1 ** 2 - 0.5 * logvar1, axis=-1)
    log_q_z2_z1 = jnp.sum(-0.5 * eps2 ** 2 - 0.5 * logvar2, axis=-1)
    z2s = jnp.exp(0.5 * logvar2) * eps2 + mu2
    z1s = jnp.exp(0.5 * logvar1) * eps1 + mu1
    dvar1 = jnp.exp(0.5 * d_logvar1)
    log_p_z2 = jnp.sum(-0.5 * z2s ** 2, axis=-1)
    log_p_z1_z2 = jnp.sum(-0.5 * ((z1s - d_mu1) / dvar1) ** 2
                          - 0.5 * d_logvar1, axis=-1)
    t2 = jnp.mean(jnp.sum(log_q_z1_x - log_p_z1_z2, axis=0))
    t3 = jnp.mean(jnp.sum(log_q_z2_z1 - log_p_z2, axis=0))
    return rec + t2 + t3


def iter_inference_loss(phi, eps, x, p):
    mu_e1, logvar_e1, mu_e2, logvar_e2 = phi
    eps1, eps2, d_eps1 = eps
    z1_s = jnp.exp(0.5 * logvar_e1) * eps1 + mu_e1
    z2_s = jnp.exp(0.5 * logvar_e2) * eps2 + mu_e2
    mu_d1, logvar_d1 = decoder2_jax(z2_s, p)
    x_rec = decoder1_jax(z1_s, p)
    return hvae_loss_jax(x, x_rec,
                         (mu_e2, logvar_e2, eps2),
                         (mu_e1, logvar_e1, eps1),
                         (mu_d1, logvar_d1, d_eps1))


_GRAD_FN = jax.grad(iter_inference_loss)   # hoisted: built once at module load


@functools.partial(jax.jit, static_argnames=("n_iters", "lr"))
def ilvae_forward(x, params, key, n_iters=N_ITERS, lr=0.01):
    """Equivalent of iLVAE.forward(x): returns the PHI dict after refinement.

    Pallas kernel initializes PHI; the n_iters-step Adam refinement is a single
    fused lax.fori_loop inside this one jit (no per-step host dispatch).
    """
    b = x.shape[0]
    key, k_eps2 = jax.random.split(key)
    eps2 = jax.random.normal(k_eps2, (b, Z2_DIM), jnp.float32)

    phi0 = ilvae_forward_init(x, eps2, params)           # Pallas hot path
    m0 = tuple(jnp.zeros_like(p) for p in phi0)
    v0 = tuple(jnp.zeros_like(p) for p in phi0)

    b1, b2, adam_eps = 0.9, 0.999, 1e-8

    def body(t, carry):
        phi, m, v = carry
        kt = jax.random.fold_in(key, t)
        k1, k2, k3 = jax.random.split(kt, 3)
        eps1_i = jax.random.normal(k1, (b, Z1_DIM), jnp.float32)
        eps2_i = jax.random.normal(k2, (b, Z2_DIM), jnp.float32)
        d_eps1 = jax.random.normal(k3, (b, Z1_DIM), jnp.float32)
        grads = _GRAD_FN(phi, (eps1_i, eps2_i, d_eps1), x, params)

        step = (t + 1).astype(jnp.float32)               # 1-indexed Adam step
        bc1 = 1.0 - b1 ** step
        bc2 = 1.0 - b2 ** step
        new_phi, new_m, new_v = [], [], []
        for p_, m_, v_, g_ in zip(phi, m, v, grads):
            m_n = b1 * m_ + (1.0 - b1) * g_
            v_n = b2 * v_ + (1.0 - b2) * g_ * g_
            mhat = m_n / bc1
            vhat = v_n / bc2
            new_phi.append(p_ - lr * mhat / (jnp.sqrt(vhat) + adam_eps))
            new_m.append(m_n)
            new_v.append(v_n)
        return tuple(new_phi), tuple(new_m), tuple(new_v)

    phi, _, _ = lax.fori_loop(0, n_iters, body, (phi0, m0, v0))

    return {"mu_e1_p": phi[0], "logvar_e1_p": phi[1],
            "mu_e2_p": phi[2], "logvar_e2_p": phi[3]}


def init_params(key):
    # NOTE: the reference module declares d1fc1 = Linear(z1_dim + 256, z1_dim)
    # but its forward feeds decoder1 a z1_dim-sized tensor; we follow the
    # forward call graph and size d1fc1 as (z1_dim -> z1_dim).
    dims = {
        "e1fc1": (784, 512), "e1fc2": (512, Z1_DIM),
        "e1fc4": (Z1_DIM, Z1_DIM), "e1fc5": (Z1_DIM, Z1_DIM),
        "e2fc1": (Z1_DIM, 256), "e2fc2": (256, 128),
        "e2fc4": (128, Z2_DIM), "e2fc5": (128, Z2_DIM),
        "d2fc1": (Z2_DIM, 128), "d2fc2": (128, 256),
        "d2fc4": (256, Z1_DIM), "d2fc5": (256, Z1_DIM),
        "d1fc1": (Z1_DIM, Z1_DIM), "d1fc2": (Z1_DIM, 512), "d1fc4": (512, 784),
    }
    params = {}
    for name, (fan_in, fan_out) in dims.items():
        key, kw = jax.random.split(key)
        bound = float(fan_in) ** -0.5
        params[name + "_w"] = jax.random.uniform(
            kw, (fan_in, fan_out), jnp.float32, -bound, bound)
        params[name + "_b"] = jnp.zeros((1, fan_out), jnp.float32)
    return params


if __name__ == "__main__":
    key = jax.random.PRNGKey(0)
    kp, kx, kf = jax.random.split(key, 3)
    params = init_params(kp)
    x = jax.random.uniform(kx, (BATCH, 784), jnp.float32)   # MNIST-like flat input
    phi = ilvae_forward(x, params, kf)
    jax.block_until_ready(phi)
    assert phi["mu_e1_p"].shape == (BATCH, Z1_DIM)
    assert phi["logvar_e1_p"].shape == (BATCH, Z1_DIM)
    assert phi["mu_e2_p"].shape == (BATCH, Z2_DIM)
    assert phi["logvar_e2_p"].shape == (BATCH, Z2_DIM)
    assert bool(jnp.all(jnp.isfinite(phi["mu_e1_p"])))
    print("KERNEL_OK")
</pallas_src>

<mosaic_0001>
module attributes {stable_mosaic.version = 11 : i64} {
  func.func @ilvae_init_kernel(%arg0: memref<8x784xf32, #tpu.memory_space<vmem>>, %arg1: memref<8x10xf32, #tpu.memory_space<vmem>>, %arg2: memref<784x512xbf16, #tpu.memory_space<vmem>>, %arg3: memref<1x512xf32, #tpu.memory_space<vmem>>, %arg4: memref<512x20xbf16, #tpu.memory_space<vmem>>, %arg5: memref<1x20xf32, #tpu.memory_space<vmem>>, %arg6: memref<20x40xf32, #tpu.memory_space<vmem>>, %arg7: memref<1x40xf32, #tpu.memory_space<vmem>>, %arg8: memref<20x256xbf16, #tpu.memory_space<vmem>>, %arg9: memref<1x256xf32, #tpu.memory_space<vmem>>, %arg10: memref<256x128xbf16, #tpu.memory_space<vmem>>, %arg11: memref<1x128xf32, #tpu.memory_space<vmem>>, %arg12: memref<128x20xf32, #tpu.memory_space<vmem>>, %arg13: memref<1x20xf32, #tpu.memory_space<vmem>>, %arg14: memref<10x128xbf16, #tpu.memory_space<vmem>>, %arg15: memref<1x128xf32, #tpu.memory_space<vmem>>, %arg16: memref<128x256xbf16, #tpu.memory_space<vmem>>, %arg17: memref<1x256xf32, #tpu.memory_space<vmem>>, %arg18: memref<256x40xf32, #tpu.memory_space<vmem>>, %arg19: memref<1x40xf32, #tpu.memory_space<vmem>>, %arg20: memref<8x128xf32, #tpu.memory_space<vmem>>) attributes {dimension_semantics = [], scalar_prefetch = 0 : i64, scratch_operands = 0 : i64, tpu.core_type = #tpu.core_type<tc>} {
    %c0 = arith.constant 0 : index
    %c0_0 = arith.constant 0 : index
    %0 = vector.load %arg0[%c0, %c0_0] : memref<8x784xf32, #tpu.memory_space<vmem>>, vector<8x784xf32>
    %c0_1 = arith.constant 0 : index
    %c0_2 = arith.constant 0 : index
    %1 = vector.load %arg2[%c0_1, %c0_2] : memref<784x512xbf16, #tpu.memory_space<vmem>>, vector<784x512xbf16>
    %2 = arith.truncf %0 : vector<8x784xf32> to vector<8x784xbf16>
    %cst = arith.constant dense<0.000000e+00> : vector<8x512xf32>
    %3 = tpu.matmul %2, %1, %cst {dimension_numbers = #tpu.dot_dimension_numbers<[1], [0], [0], [1], [0, 0, 1, 1], [], []>} : vector<8x784xbf16>, vector<784x512xbf16>, vector<8x512xf32> -> vector<8x512xf32>
    %c0_3 = arith.constant 0 : index
    %c0_4 = arith.constant 0 : index
    %4 = vector.load %arg3[%c0_3, %c0_4] : memref<1x512xf32, #tpu.memory_space<vmem>>, vector<1x512xf32>
    %5 = vector.broadcast %4 : vector<1x512xf32> to vector<8x512xf32>
    %6 = arith.addf %3, %5 : vector<8x512xf32>
    %7 = math.tanh %6 : vector<8x512xf32>
    %c0_5 = arith.constant 0 : index
    %c0_6 = arith.constant 0 : index
    %8 = vector.load %arg4[%c0_5, %c0_6] : memref<512x20xbf16, #tpu.memory_space<vmem>>, vector<512x20xbf16>
    %9 = arith.truncf %7 : vector<8x512xf32> to vector<8x512xbf16>
    %cst_7 = arith.constant dense<0.000000e+00> : vector<8x20xf32>
    %10 = tpu.matmul %9, %8, %cst_7 {dimension_numbers = #tpu.dot_dimension_numbers<[1], [0], [0], [1], [0, 0, 1, 1], [], []>} : vector<8x512xbf16>, vector<512x20xbf16>, vector<8x20xf32> -> vector<8x20xf32>
    %c0_8 = arith.constant 0 : index
    %c0_9 = arith.constant 0 : index
    %11 = vector.load %arg5[%c0_8, %c0_9] : memref<1x20xf32, #tpu.memory_space<vmem>>, vector<1x20xf32>
    %12 = vector.broadcast %11 : vector<1x20xf32> to vector<8x20xf32>
    %13 = arith.addf %10, %12 : vector<8x20xf32>
    %14 = math.tanh %13 : vector<8x20xf32>
    %c0_10 = arith.constant 0 : index
    %c0_11 = arith.constant 0 : index
    %15 = vector.load %arg6[%c0_10, %c0_11] : memref<20x40xf32, #tpu.memory_space<vmem>>, vector<20x40xf32>
    %cst_12 = arith.constant dense<0.000000e+00> : vector<8x40xf32>
    %16 = tpu.matmul %14, %15, %cst_12 {dimension_numbers = #tpu.dot_dimension_numbers<[1], [0], [0], [1], [0, 0, 1, 1], [], []>} : vector<8x20xf32>, vector<20x40xf32>, vector<8x40xf32> -> vector<8x40xf32>
    %c0_13 = arith.constant 0 : index
    %c0_14 = arith.constant 0 : index
    %17 = vector.load %arg7[%c0_13, %c0_14] : memref<1x40xf32, #tpu.memory_space<vmem>>, vector<1x40xf32>
    %18 = vector.broadcast %17 : vector<1x40xf32> to vector<8x40xf32>
    %19 = arith.addf %16, %18 : vector<8x40xf32>
    %20 = vector.extract_strided_slice %19 {offsets = [0, 0], sizes = [8, 20], strides = [1, 1]} : vector<8x40xf32> to vector<8x20xf32>
    %21 = vector.extract_strided_slice %19 {offsets = [0, 20], sizes = [8, 20], strides = [1, 1]} : vector<8x40xf32> to vector<8x20xf32>
    %cst_15 = arith.constant 0.000000e+00 : f32
    %22 = vector.broadcast %cst_15 : f32 to vector<8x20xf32>
    %23 = arith.maximumf %21, %22 : vector<8x20xf32>
    %24 = math.absf %21 : vector<8x20xf32>
    %cst_16 = arith.constant 0.000000e+00 : f32
    %25 = vector.broadcast %cst_16 : f32 to vector<8x20xf32>
    %26 = arith.subf %25, %24 : vector<8x20xf32>
    %27 = math.exp %26 : vector<8x20xf32>
    %28 = math.log1p %27 : vector<8x20xf32>
    %29 = arith.addf %23, %28 : vector<8x20xf32>
    %cst_17 = arith.constant 9.99999993E-9 : f32
    %30 = vector.broadcast %cst_17 : f32 to vector<8x20xf32>
    %31 = arith.addf %29, %30 : vector<8x20xf32>
    %32 = math.log %31 : vector<8x20xf32>
    %c0_18 = arith.constant 0 : index
    %c0_19 = arith.constant 0 : index
    %33 = vector.load %arg8[%c0_18, %c0_19] : memref<20x256xbf16, #tpu.memory_space<vmem>>, vector<20x256xbf16>
    %34 = arith.truncf %14 : vector<8x20xf32> to vector<8x20xbf16>
    %cst_20 = arith.constant dense<0.000000e+00> : vector<8x256xf32>
    %35 = tpu.matmul %34, %33, %cst_20 {dimension_numbers = #tpu.dot_dimension_numbers<[1], [0], [0], [1], [0, 0, 1, 1], [], []>} : vector<8x20xbf16>, vector<20x256xbf16>, vector<8x256xf32> -> vector<8x256xf32>
    %c0_21 = arith.constant 0 : index
    %c0_22 = arith.constant 0 : index
    %36 = vector.load %arg9[%c0_21, %c0_22] : memref<1x256xf32, #tpu.memory_space<vmem>>, vector<1x256xf32>
    %37 = vector.broadcast %36 : vector<1x256xf32> to vector<8x256xf32>
    %38 = arith.addf %35, %37 : vector<8x256xf32>
    %39 = math.tanh %38 : vector<8x256xf32>
    %c0_23 = arith.constant 0 : index
    %c0_24 = arith.constant 0 : index
    %40 = vector.load %arg10[%c0_23, %c0_24] : memref<256x128xbf16, #tpu.memory_space<vmem>>, vector<256x128xbf16>
    %41 = arith.truncf %39 : vector<8x256xf32> to vector<8x256xbf16>
    %cst_25 = arith.constant dense<0.000000e+00> : vector<8x128xf32>
    %42 = tpu.matmul %41, %40, %cst_25 {dimension_numbers = #tpu.dot_dimension_numbers<[1], [0], [0], [1], [0, 0, 1, 1], [], []>} : vector<8x256xbf16>, vector<256x128xbf16>, vector<8x128xf32> -> vector<8x128xf32>
    %c0_26 = arith.constant 0 : index
    %c0_27 = arith.constant 0 : index
    %43 = vector.load %arg11[%c0_26, %c0_27] : memref<1x128xf32, #tpu.memory_space<vmem>>, vector<1x128xf32>
    %44 = vector.broadcast %43 : vector<1x128xf32> to vector<8x128xf32>
    %45 = arith.addf %42, %44 : vector<8x128xf32>
    %46 = math.tanh %45 : vector<8x128xf32>
    %c0_28 = arith.constant 0 : index
    %c0_29 = arith.constant 0 : index
    %47 = vector.load %arg12[%c0_28, %c0_29] : memref<128x20xf32, #tpu.memory_space<vmem>>, vector<128x20xf32>
    %cst_30 = arith.constant dense<0.000000e+00> : vector<8x20xf32>
    %48 = tpu.matmul %46, %47, %cst_30 {dimension_numbers = #tpu.dot_dimension_numbers<[1], [0], [0], [1], [0, 0, 1, 1], [], []>} : vector<8x128xf32>, vector<128x20xf32>, vector<8x20xf32> -> vector<8x20xf32>
    %c0_31 = arith.constant 0 : index
    %c0_32 = arith.constant 0 : index
    %49 = vector.load %arg13[%c0_31, %c0_32] : memref<1x20xf32, #tpu.memory_space<vmem>>, vector<1x20xf32>
    %50 = vector.broadcast %49 : vector<1x20xf32> to vector<8x20xf32>
    %51 = arith.addf %48, %50 : vector<8x20xf32>
    %52 = vector.extract_strided_slice %51 {offsets = [0, 0], sizes = [8, 10], strides = [1, 1]} : vector<8x20xf32> to vector<8x10xf32>
    %53 = vector.extract_strided_slice %51 {offsets = [0, 10], sizes = [8, 10], strides = [1, 1]} : vector<8x20xf32> to vector<8x10xf32>
    %cst_33 = arith.constant 0.000000e+00 : f32
    %54 = vector.broadcast %cst_33 : f32 to vector<8x10xf32>
    %55 = arith.maximumf %53, %54 : vector<8x10xf32>
    %56 = math.absf %53 : vector<8x10xf32>
    %cst_34 = arith.constant 0.000000e+00 : f32
    %57 = vector.broadcast %cst_34 : f32 to vector<8x10xf32>
    %58 = arith.subf %57, %56 : vector<8x10xf32>
    %59 = math.exp %58 : vector<8x10xf32>
    %60 = math.log1p %59 : vector<8x10xf32>
    %61 = arith.addf %55, %60 : vector<8x10xf32>
    %cst_35 = arith.constant 9.99999993E-9 : f32
    %62 = vector.broadcast %cst_35 : f32 to vector<8x10xf32>
    %63 = arith.addf %61, %62 : vector<8x10xf32>
    %64 = math.log %63 : vector<8x10xf32>
    %cst_36 = arith.constant 5.000000e-01 : f32
    %65 = vector.broadcast %cst_36 : f32 to vector<8x10xf32>
    %66 = arith.mulf %65, %64 : vector<8x10xf32>
    %67 = math.exp %66 : vector<8x10xf32>
    %c0_37 = arith.constant 0 : index
    %c0_38 = arith.constant 0 : index
    %68 = vector.load %arg1[%c0_37, %c0_38] : memref<8x10xf32, #tpu.memory_space<vmem>>, vector<8x10xf32>
    %69 = arith.mulf %67, %68 : vector<8x10xf32>
    %70 = arith.addf %69, %52 : vector<8x10xf32>
    %c0_39 = arith.constant 0 : index
    %c0_40 = arith.constant 0 : index
    %71 = vector.load %arg14[%c0_39, %c0_40] : memref<10x128xbf16, #tpu.memory_space<vmem>>, vector<10x128xbf16>
    %72 = arith.truncf %70 : vector<8x10xf32> to vector<8x10xbf16>
    %cst_41 = arith.constant dense<0.000000e+00> : vector<8x128xf32>
    %73 = tpu.matmul %72, %71, %cst_41 {dimension_numbers = #tpu.dot_dimension_numbers<[1], [0], [0], [1], [0, 0, 1, 1], [], []>} : vector<8x10xbf16>, vector<10x128xbf16>, vector<8x128xf32> -> vector<8x128xf32>
    %c0_42 = arith.constant 0 : index
    %c0_43 = arith.constant 0 : index
    %74 = vector.load %arg15[%c0_42, %c0_43] : memref<1x128xf32, #tpu.memory_space<vmem>>, vector<1x128xf32>
    %75 = vector.broadcast %74 : vector<1x128xf32> to vector<8x128xf32>
    %76 = arith.addf %73, %75 : vector<8x128xf32>
    %77 = math.tanh %76 : vector<8x128xf32>
    %c0_44 = arith.constant 0 : index
    %c0_45 = arith.constant 0 : index
    %78 = vector.load %arg16[%c0_44, %c0_45] : memref<128x256xbf16, #tpu.memory_space<vmem>>, vector<128x256xbf16>
    %79 = arith.truncf %77 : vector<8x128xf32> to vector<8x128xbf16>
    %cst_46 = arith.constant dense<0.000000e+00> : vector<8x256xf32>
    %80 = tpu.matmul %79, %78, %cst_46 {dimension_numbers = #tpu.dot_dimension_numbers<[1], [0], [0], [1], [0, 0, 1, 1], [], []>} : vector<8x128xbf16>, vector<128x256xbf16>, vector<8x256xf32> -> vector<8x256xf32>
    %c0_47 = arith.constant 0 : index
    %c0_48 = arith.constant 0 : index
    %81 = vector.load %arg17[%c0_47, %c0_48] : memref<1x256xf32, #tpu.memory_space<vmem>>, vector<1x256xf32>
    %82 = vector.broadcast %81 : vector<1x256xf32> to vector<8x256xf32>
    %83 = arith.addf %80, %82 : vector<8x256xf32>
    %84 = math.tanh %83 : vector<8x256xf32>
    %c0_49 = arith.constant 0 : index
    %c0_50 = arith.constant 0 : index
    %85 = vector.load %arg18[%c0_49, %c0_50] : memref<256x40xf32, #tpu.memory_space<vmem>>, vector<256x40xf32>
    %cst_51 = arith.constant dense<0.000000e+00> : vector<8x40xf32>
    %86 = tpu.matmul %84, %85, %cst_51 {dimension_numbers = #tpu.dot_dimension_numbers<[1], [0], [0], [1], [0, 0, 1, 1], [], []>} : vector<8x256xf32>, vector<256x40xf32>, vector<8x40xf32> -> vector<8x40xf32>
    %c0_52 = arith.constant 0 : index
    %c0_53 = arith.constant 0 : index
    %87 = vector.load %arg19[%c0_52, %c0_53] : memref<1x40xf32, #tpu.memory_space<vmem>>, vector<1x40xf32>
    %88 = vector.broadcast %87 : vector<1x40xf32> to vector<8x40xf32>
    %89 = arith.addf %86, %88 : vector<8x40xf32>
    %90 = vector.extract_strided_slice %89 {offsets = [0, 0], sizes = [8, 20], strides = [1, 1]} : vector<8x40xf32> to vector<8x20xf32>
    %91 = vector.extract_strided_slice %89 {offsets = [0, 20], sizes = [8, 20], strides = [1, 1]} : vector<8x40xf32> to vector<8x20xf32>
    %cst_54 = arith.constant 0.000000e+00 : f32
    %92 = vector.broadcast %cst_54 : f32 to vector<8x20xf32>
    %93 = arith.maximumf %91, %92 : vector<8x20xf32>
    %94 = math.absf %91 : vector<8x20xf32>
    %cst_55 = arith.constant 0.000000e+00 : f32
    %95 = vector.broadcast %cst_55 : f32 to vector<8x20xf32>
    %96 = arith.subf %95, %94 : vector<8x20xf32>
    %97 = math.exp %96 : vector<8x20xf32>
    %98 = math.log1p %97 : vector<8x20xf32>
    %99 = arith.addf %93, %98 : vector<8x20xf32>
    %cst_56 = arith.constant 9.99999993E-9 : f32
    %100 = vector.broadcast %cst_56 : f32 to vector<8x20xf32>
    %101 = arith.addf %99, %100 : vector<8x20xf32>
    %102 = math.log %101 : vector<8x20xf32>
    %cst_57 = arith.constant 0.000000e+00 : f32
    %103 = vector.broadcast %cst_57 : f32 to vector<8x20xf32>
    %104 = arith.subf %103, %32 : vector<8x20xf32>
    %cst_58 = arith.constant 0.000000e+00 : f32
    %105 = vector.broadcast %cst_58 : f32 to vector<8x20xf32>
    %106 = arith.subf %105, %102 : vector<8x20xf32>
    %107 = arith.maximumf %104, %106 : vector<8x20xf32>
    %108 = arith.subf %104, %107 : vector<8x20xf32>
    %109 = math.exp %108 : vector<8x20xf32>
    %110 = arith.subf %106, %107 : vector<8x20xf32>
    %111 = math.exp %110 : vector<8x20xf32>
    %112 = arith.addf %109, %111 : vector<8x20xf32>
    %113 = tpu.reciprocal %112 {approx = true} : vector<8x20xf32> -> vector<8x20xf32>
    %114 = arith.mulf %20, %109 : vector<8x20xf32>
    %115 = arith.mulf %90, %111 : vector<8x20xf32>
    %116 = arith.addf %114, %115 : vector<8x20xf32>
    %117 = arith.mulf %116, %113 : vector<8x20xf32>
    %118 = math.log %112 : vector<8x20xf32>
    %119 = arith.addf %107, %118 : vector<8x20xf32>
    %cst_59 = arith.constant 0.000000e+00 : f32
    %120 = vector.broadcast %cst_59 : f32 to vector<8x20xf32>
    %121 = arith.subf %120, %119 : vector<8x20xf32>
    %cst_60 = arith.constant 0.000000e+00 : f32
    %122 = vector.broadcast %cst_60 : f32 to vector<8x128xf32>
    %c0_61 = arith.constant 0 : index
    %c0_62 = arith.constant 0 : index
    %123 = vector.load %arg20[%c0_61, %c0_62] : memref<8x128xf32, #tpu.memory_space<vmem>>, vector<8x128xf32>
    tpu.vector_store %arg20[%c0_61, %c0_62], %122 {strides = array<i32>} : memref<8x128xf32, #tpu.memory_space<vmem>>, vector<8x128xf32>,
    %c0_63 = arith.constant 0 : index
    %c0_64 = arith.constant 0 : index
    %124 = vector.load %arg20[%c0_63, %c0_64] : memref<8x128xf32, #tpu.memory_space<vmem>>, vector<8x20xf32>
    tpu.vector_store %arg20[%c0_63, %c0_64], %117 {strides = array<i32>} : memref<8x128xf32, #tpu.memory_space<vmem>>, vector<8x20xf32>,
    %c0_65 = arith.constant 0 : index
    %c20 = arith.constant 20 : index
    %125 = vector.load %arg20[%c0_65, %c20] : memref<8x128xf32, #tpu.memory_space<vmem>>, vector<8x20xf32>
    tpu.vector_store %arg20[%c0_65, %c20], %121 {strides = array<i32>} : memref<8x128xf32, #tpu.memory_space<vmem>>, vector<8x20xf32>,
    %c0_66 = arith.constant 0 : index
    %c40 = arith.constant 40 : index
    %126 = vector.load %arg20[%c0_66, %c40] : memref<8x128xf32, #tpu.memory_space<vmem>>, vector<8x10xf32>
    tpu.vector_store %arg20[%c0_66, %c40], %52 {strides = array<i32>} : memref<8x128xf32, #tpu.memory_space<vmem>>, vector<8x10xf32>,
    %c0_67 = arith.constant 0 : index
    %c50 = arith.constant 50 : index
    %127 = vector.load %arg20[%c0_67, %c50] : memref<8x128xf32, #tpu.memory_space<vmem>>, vector<8x10xf32>
    tpu.vector_store %arg20[%c0_67, %c50], %64 {strides = array<i32>} : memref<8x128xf32, #tpu.memory_space<vmem>>, vector<8x10xf32>,
    return
  }
}

</mosaic_0001>

<bundles_post_ra>
// kernel: custom-call
= control target key start
LH: loop header
LB: loop body
LE: loop exit
PB: predicated region body
PF: predicated region fallthrough
CT: control target
= control target key end

     0   :  { %s6_s0 = inlined_call_operand.vmem [shape: f32[8,20], index: 0, kind: output, shape index: {}]  }

// kernel: custom-call.2
= control target key start
LH: loop header
LB: loop body
LE: loop exit
PB: predicated region body
PF: predicated region fallthrough
CT: control target
= control target key end

     0   :  { %s6_s0 = inlined_call_operand.vmem [shape: f32[8,10], index: 0, kind: output, shape index: {}]  }

// kernel: ilvae_forward.3
= control target key start
LH: loop header
LB: loop body
LE: loop exit
PB: predicated region body
PF: predicated region fallthrough
CT: control target
= control target key end

     0   :  { %vm1278_vm0 = vcmask 130048   ;;  %vm3822_vm1 = vmmov 0   ;;  %vm2102_vm2 = vcmask 1041408   ;;  %vm1976_vm3 = vcmask 1043456   ;;  %s3825_s24 = smov 118   ;;  %s3827_s28 = smov 40   ;;  %s5002_s2 = inlined_call_operand.vmem [shape: bf16[784,512], index: 2, kind: input, shape index: {}]   ;;  %s5003_s0 = inlined_call_operand.vmem [shape: f32[8,784], index: 0, kind: input, shape index: {}]   ;;  %s5004_s4 = inlined_call_operand.vmem [shape: bf16[512,20], index: 4, kind: input, shape index: {}]   ;;  %s5005_s3 = inlined_call_operand.vmem [shape: f32[1,512], index: 3, kind: input, shape index: {}]   ;;  %s5006_s8 = inlined_call_operand.vmem [shape: bf16[20,256], index: 8, kind: input, shape index: {}]   ;;  %s5007_s6 = inlined_call_operand.vmem [shape: f32[20,40], index: 6, kind: input, shape index: {}]   ;;  %s5008_s10 = inlined_call_operand.vmem [shape: bf16[256,128], index: 10, kind: input, shape index: {}]   ;;  %s5009_s5 = inlined_call_operand.vmem [shape: f32[1,20], index: 5, kind: input, shape index: {}]   ;;  %s5010_s12 = inlined_call_operand.vmem [shape: f32[128,20], index: 12, kind: input, shape index: {}]   ;;  %s5011_s9 = inlined_call_operand.vmem [shape: f32[1,256], index: 9, kind: input, shape index: {}]   ;;  %s5012_s1 = inlined_call_operand.vmem [shape: f32[8,10], index: 1, kind: input, shape index: {}]   ;;  %s5013_s11 = inlined_call_operand.vmem [shape: f32[1,128], index: 11, kind: input, shape index: {}]   ;;  %s5014_s14 = inlined_call_operand.vmem [shape: bf16[10,128], index: 14, kind: input, shape index: {}]   ;;  %s5015_s13 = inlined_call_operand.vmem [shape: f32[1,20], index: 13, kind: input, shape index: {}]   ;;  %s5016_s16 = inlined_call_operand.vmem [shape: bf16[128,256], index: 16, kind: input, shape index: {}]   ;;  %s5017_s18 = inlined_call_operand.vmem [shape: f32[256,40], index: 18, kind: input, shape index: {}]   ;;  %s5018_s15 = inlined_call_operand.vmem [shape: f32[1,128], index: 15, kind: input, shape index: {}]   ;;  %s5019_s17 = inlined_call_operand.vmem [shape: f32[1,256], index: 17, kind: input, shape index: {}]   ;;  %s5020_s7 = inlined_call_operand.vmem [shape: f32[1,40], index: 7, kind: input, shape index: {}]   ;;  %s5021_s19 = inlined_call_operand.vmem [shape: f32[1,40], index: 19, kind: input, shape index: {}]   ;;  %s5022_s20 = inlined_call_operand.vmem [shape: f32[8,128], index: 20, kind: output, shape index: {}]  }
   0x1   :  { %5027 = sst [smem:[#allocation2_spill]] %s5002_s2  ;;  %vm1972_vm4 = vcmask 162816   ;;  %vm2477_vm5 = vcmask 1044480   ;;  %vm2473_vm7 = vcmask 80896   ;;  %vm2834_vm10 = vcmask 326816  }
   0x2   :  { %5028 = sst [smem:[#allocation3_spill]] %s5003_s0  ;;  %s5032_s23 = sld [smem:[#allocation2_spill]]  ;;  %vm2839_vm11 = vcmask 408896   ;;  %vm2845_vm12 = vcmask 490896  }
   0x3   :  { %5029 = sst [smem:[#allocation4_spill]] %s5004_s4  ;;  %s5033_s29 = sld [smem:[#allocation3_spill]] }
   0x4   :  { %5030 = sst [smem:[#allocation5_spill]] %s5005_s3  ;;  %s5034_s30 = sld [smem:[#allocation4_spill]] }
   0x5   :  { %5031 = sst [smem:[#allocation6_spill]] %s5006_s8  ;;  %s5035_s27 = sld [smem:[#allocation5_spill]] }
   0x6   :  { %s3824_s3 = smov 10  }
   0x8   :  { %v3398_v0 = vld [vmem:[%s5032_s23 + $0x4] ss:$16 sps:$4 sm:$0xff]   ;;  %v3400_v1 = vld [vmem:[%s5032_s23 + $0xc] ss:$16 sps:$4 sm:$0xff]   ;;  %v3402_v2 = vld [vmem:[%s5032_s23] ss:$16 sps:$4 sm:$0xff]  }
   0x9   :  { %1282 = vmatprep.subr.bf16.mxu0 %v3398_v0  ;;  %v3403_v3 = vld [vmem:[%s5032_s23 + $0x8] ss:$16 sps:$4 sm:$0xff]   ;;  %1446 = vmatprep.subr.bf16.mxu1 %v3400_v1  ;;  %v3404_v4 = vld [vmem:[%s5032_s23 + $0x24] ss:$16 sps:$4 sm:$0xff]   ;;  %v3406_v5 = vld [vmem:[%s5032_s23 + $0x2c] ss:$16 sps:$4 sm:$0xff]  }
   0xa   :  { %1283 = vmatpush1.bf16.msra.mxu0 %v3402_v2  ;;  %1447 = vmatpush1.bf16.msra.mxu1 %v3403_v3  ;;  %v3408_v6 = vld [vmem:[%s5032_s23 + $0x20] ss:$16 sps:$4 sm:$0xff]   ;;  %v3409_v7 = vld [vmem:[%s5032_s23 + $0x28] ss:$16 sps:$4 sm:$0xff]   ;;  %v3410_v8 = vld [vmem:[%s5032_s23 + $0x44] ss:$16 sps:$4 sm:$0xff]  }
   0xb   :  { %1284 = vmatprep.subr.bf16.mxu0 %v3404_v4  ;;  %1448 = vmatprep.subr.bf16.mxu1 %v3406_v5  ;;  %v3412_v9 = vld [vmem:[%s5032_s23 + $0x4c] ss:$16 sps:$4 sm:$0xff]   ;;  %v3414_v10 = vld [vmem:[%s5032_s23 + $0x40] ss:$16 sps:$4 sm:$0xff]   ;;  %v3415_v11 = vld [vmem:[%s5032_s23 + $0x48] ss:$16 sps:$4 sm:$0xff]  }
   0xc   :  { %v3416_v12 = vld [vmem:[%s5032_s23 + $0x64] ss:$16 sps:$4 sm:$0xff]   ;;  %v3418_v13 = vld [vmem:[%s5032_s23 + $0x6c] ss:$16 sps:$4 sm:$0xff]   ;;  %v3420_v14 = vld [vmem:[%s5032_s23 + $0x60] ss:$16 sps:$4 sm:$0xff]  }
   0xd   :  { %v3421_v15 = vld [vmem:[%s5032_s23 + $0x68] ss:$16 sps:$4 sm:$0xff]   ;;  %v3422_v16 = vld [vmem:[%s5032_s23 + $0x84] ss:$16 sps:$4 sm:$0xff]   ;;  %v3424_v17 = vld [vmem:[%s5032_s23 + $0x8c] ss:$16 sps:$4 sm:$0xff]  }
   0xe   :  { %1285 = vmatpush1.bf16.msra.mxu0 %v3408_v6  ;;  %1449 = vmatpush1.bf16.msra.mxu1 %v3409_v7  ;;  %v3426_v18 = vld [vmem:[%s5032_s23 + $0x80] ss:$16 sps:$4 sm:$0xff]   ;;  %v3427_v19 = vld [vmem:[%s5032_s23 + $0x88] ss:$16 sps:$4 sm:$0xff]   ;;  %v3428_v20 = vld [vmem:[%s5032_s23 + $0xa4] ss:$16 sps:$4 sm:$0xff]  }
   0xf   :  { %1286 = vmatprep.subr.bf16.mxu0 %v3410_v8  ;;  %1450 = vmatprep.subr.bf16.mxu1 %v3412_v9  ;;  %v3430_v21 = vld [vmem:[%s5032_s23 + $0xac] ss:$16 sps:$4 sm:$0xff]   ;;  %v3432_v22 = vld [vmem:[%s5032_s23 + $0xa0] ss:$16 sps:$4 sm:$0xff]   ;;  %v3433_v23 = vld [vmem:[%s5032_s23 + $0xa8] ss:$16 sps:$4 sm:$0xff]  }
  0x10   :  { %v3434_v24 = vld [vmem:[%s5032_s23 + $0xc4] ss:$16 sps:$4 sm:$0xff]   ;;  %v3436_v25 = vld [vmem:[%s5032_s23 + $0xcc] ss:$16 sps:$4 sm:$0xff]   ;;  %v3438_v26 = vld [vmem:[%s5032_s23 + $0xc0] ss:$16 sps:$4 sm:$0xff]  }
  0x11   :  { %v3439_v27 = vld [vmem:[%s5032_s23 + $0xc8] ss:$16 sps:$4 sm:$0xff]   ;;  %v3440_v28 = vld [vmem:[%s5032_s23 + $0xe4] ss:$16 sps:$4 sm:$0xff]   ;;  %v3442_v29 = vld [vmem:[%s5032_s23 + $0xec] ss:$16 sps:$4 sm:$0xff]  }
  0x12   :  { %1287 = vmatpush1.bf16.msra.mxu0 %v3414_v10  ;;  %1451 = vmatpush1.bf16.msra.mxu1 %v3415_v11  ;;  %v3444_v30 = vld [vmem:[%s5032_s23 + $0xe0] ss:$16 sps:$4 sm:$0xff]   ;;  %v3445_v31 = vld [vmem:[%s5032_s23 + $0xe8] ss:$16 sps:$4 sm:$0xff]   ;;  %v3446_v32 = vld [vmem:[%s5032_s23 + $0x104] ss:$16 sps:$4 sm:$0xff]  }
  0x13   :  { %1288 = vmatprep.subr.bf16.mxu0 %v3416_v12  ;;  %1452 = vmatprep.subr.bf16.mxu1 %v3418_v13  ;;  %v3448_v33 = vld [vmem:[%s5032_s23 + $0x10c] ss:$16 sps:$4 sm:$0xff]   ;;  %v3450_v34 = vld [vmem:[%s5032_s23 + $0x100] ss:$16 sps:$4 sm:$0xff]   ;;  %v3451_v35 = vld [vmem:[%s5032_s23 + $0x108] ss:$16 sps:$4 sm:$0xff]  }
  0x14   :  { %v3452_v36 = vld [vmem:[%s5032_s23 + $0x124] ss:$16 sps:$4 sm:$0xff]   ;;  %v3454_v37 = vld [vmem:[%s5032_s23 + $0x12c] ss:$16 sps:$4 sm:$0xff]   ;;  %v3456_v38 = vld [vmem:[%s5032_s23 + $0x120] ss:$16 sps:$4 sm:$0xff]  }
  0x15   :  { %v3457_v39 = vld [vmem:[%s5032_s23 + $0x128] ss:$16 sps:$4 sm:$0xff]   ;;  %v3458_v40 = vld [vmem:[%s5032_s23 + $0x144] ss:$16 sps:$4 sm:$0xff]   ;;  %v3460_v41 = vld [vmem:[%s5032_s23 + $0x14c] ss:$16 sps:$4 sm:$0xff]  }
  0x16   :  { %1289 = vmatpush1.bf16.msra.mxu0 %v3420_v14  ;;  %1453 = vmatpush1.bf16.msra.mxu1 %v3421_v15  ;;  %v3462_v42 = vld [vmem:[%s5032_s23 + $0x140] ss:$16 sps:$4 sm:$0xff]   ;;  %v3463_v43 = vld [vmem:[%s5032_s23 + $0x148] ss:$16 sps:$4 sm:$0xff]   ;;  %v3464_v44 = vld [vmem:[%s5032_s23 + $0x164] ss:$16 sps:$4 sm:$0xff]  }
  0x17   :  { %1290 = vmatprep.subr.bf16.mxu0 %v3422_v16  ;;  %1454 = vmatprep.subr.bf16.mxu1 %v3424_v17  ;;  %v3466_v45 = vld [vmem:[%s5032_s23 + $0x16c] ss:$16 sps:$4 sm:$0xff]   ;;  %v3468_v47 = vld [vmem:[%s5032_s23 + $0x160] ss:$16 sps:$4 sm:$0xff]   ;;  %v3469_v49 = vld [vmem:[%s5032_s23 + $0x168] ss:$16 sps:$4 sm:$0xff]  }
  0x18   :  { %v67_v46 = vld [vmem:[%s5033_s29 + $0x8] sm:$0xff]  ;;  %v3470_v50 = vld [vmem:[%s5032_s23 + $0x184] ss:$16 sps:$4 sm:$0xff]   ;;  %v3474_v52 = vld [vmem:[%s5032_s23 + $0x180] ss:$16 sps:$4 sm:$0xff]  }
  0x19   :  { %v270_v48 = vpack.c.bf16 %v67_v46, %v67_v46  ;;  %v3472_v51 = vld [vmem:[%s5032_s23 + $0x18c] ss:$16 sps:$4 sm:$0xff]   ;;  %v3475_v53 = vld [vmem:[%s5032_s23 + $0x188] ss:$16 sps:$4 sm:$0xff]   ;;  %v3476_v54 = vld [vmem:[%s5032_s23 + $0x1a4] ss:$16 sps:$4 sm:$0xff]  }
  0x1a   :  { %1291 = vmatpush1.bf16.msra.mxu0 %v3426_v18  ;;  %1455 = vmatpush1.bf16.msra.mxu1 %v3427_v19  ;;  %v3478_v55 = vld [vmem:[%s5032_s23 + $0x1ac] ss:$16 sps:$4 sm:$0xff]   ;;  %v3480_v56 = vld [vmem:[%s5032_s23 + $0x1a0] ss:$16 sps:$4 sm:$0xff]   ;;  %v3481_v57 = vld [vmem:[%s5032_s23 + $0x1a8] ss:$16 sps:$4 sm:$0xff]  }
  0x1b   :  { %1292 = vmatprep.subr.bf16.mxu0 %v3428_v20  ;;  %1456 = vmatprep.subr.bf16.mxu1 %v3430_v21  ;;  %v3482_v58 = vld [vmem:[%s5032_s23 + $0x1c4] ss:$16 sps:$4 sm:$0xff]   ;;  %v3484_v59 = vld [vmem:[%s5032_s23 + $0x1cc] ss:$16 sps:$4 sm:$0xff]   ;;  %v3486_v60 = vld [vmem:[%s5032_s23 + $0x1c0] ss:$16 sps:$4 sm:$0xff]  }
  0x1c   :  { %1314 = vmatprep.mubr.bf16.mxu0 %v270_v48  ;;  %1478 = vmatprep.mubr.bf16.mxu1 %v270_v48  ;;  %v3487_v61 = vld [vmem:[%s5032_s23 + $0x1c8] ss:$16 sps:$4 sm:$0xff]   ;;  %v3488_v62 = vld [vmem:[%s5032_s23 + $0x1e4] ss:$16 sps:$4 sm:$0xff]   ;;  %v3490_v63 = vld [vmem:[%s5032_s23 + $0x1ec] ss:$16 sps:$4 sm:$0xff]  }
  0x1d   :  { %v3492_v0 = vld [vmem:[%s5032_s23 + $0x1e0] ss:$16 sps:$4 sm:$0xff]   ;;  %v3493_v1 = vld [vmem:[%s5032_s23 + $0x1e8] ss:$16 sps:$4 sm:$0xff]   ;;  %v3496_v3 = vld [vmem:[%s5032_s23 + $0x204] ss:$16 sps:$4 sm:$0xff]  }
  0x1e   :  { %1293 = vmatpush1.bf16.msra.mxu0 %v3432_v22  ;;  %1457 = vmatpush1.bf16.msra.mxu1 %v3433_v23  ;;  %v66_v2 = vld [vmem:[%s5033_s29] sm:$0xff]  ;;  %v3499_v4 = vld [vmem:[%s5032_s23 + $0x20c] ss:$16 sps:$4 sm:$0xff]   ;;  %v3497_v7 = vld [vmem:[%s5032_s23 + $0x208] ss:$16 sps:$4 sm:$0xff]  }
  0x1f   :  { %1294 = vmatprep.subr.bf16.mxu0 %v3434_v24  ;;  %1458 = vmatprep.subr.bf16.mxu1 %v3436_v25  ;;  %v269_v5 = vpack.c.bf16 %v66_v2, %v66_v2  ;;  %v3494_v6 = vld [vmem:[%s5032_s23 + $0x200] ss:$16 sps:$4 sm:$0xff]   ;;  %v3502_v8 = vld [vmem:[%s5032_s23 + $0x224] ss:$16 sps:$4 sm:$0xff]   ;;  %v3505_v9 = vld [vmem:[%s5032_s23 + $0x22c] ss:$16 sps:$4 sm:$0xff]  }
  0x20   :  { %v3500_v10 = vld [vmem:[%s5032_s23 + $0x220] ss:$16 sps:$4 sm:$0xff]   ;;  %v3503_v11 = vld [vmem:[%s5032_s23 + $0x228] ss:$16 sps:$4 sm:$0xff]   ;;  %v3508_v12 = vld [vmem:[%s5032_s23 + $0x244] ss:$16 sps:$4 sm:$0xff]  }
  0x21   :  { %v3511_v13 = vld [vmem:[%s5032_s23 + $0x24c] ss:$16 sps:$4 sm:$0xff]   ;;  %v3506_v14 = vld [vmem:[%s5032_s23 + $0x240] ss:$16 sps:$4 sm:$0xff]   ;;  %v3509_v15 = vld [vmem:[%s5032_s23 + $0x248] ss:$16 sps:$4 sm:$0xff]  }
  0x22   :  { %1295 = vmatpush1.bf16.msra.mxu0 %v3438_v26  ;;  %1459 = vmatpush1.bf16.msra.mxu1 %v3439_v27  ;;  %v3514_v16 = vld [vmem:[%s5032_s23 + $0x264] ss:$16 sps:$4 sm:$0xff]   ;;  %v3517_v17 = vld [vmem:[%s5032_s23 + $0x26c] ss:$16 sps:$4 sm:$0xff]   ;;  %v3512_v18 = vld [vmem:[%s5032_s23 + $0x260] ss:$16 sps:$4 sm:$0xff]  }
  0x23   :  { %1296 = vmatprep.subr.bf16.mxu0 %v3440_v28  ;;  %1460 = vmatprep.subr.bf16.mxu1 %v3442_v29  ;;  %v3515_v19 = vld [vmem:[%s5032_s23 + $0x268] ss:$16 sps:$4 sm:$0xff]   ;;  %v3520_v20 = vld [vmem:[%s5032_s23 + $0x284] ss:$16 sps:$4 sm:$0xff]   ;;  %v3523_v21 = vld [vmem:[%s5032_s23 + $0x28c] ss:$16 sps:$4 sm:$0xff]  }
  0x24   :  { %v3518_v22 = vld [vmem:[%s5032_s23 + $0x280] ss:$16 sps:$4 sm:$0xff]   ;;  %v3521_v23 = vld [vmem:[%s5032_s23 + $0x288] ss:$16 sps:$4 sm:$0xff]   ;;  %v3526_v24 = vld [vmem:[%s5032_s23 + $0x2a4] ss:$16 sps:$4 sm:$0xff]  }
  0x25   :  { %v3529_v25 = vld [vmem:[%s5032_s23 + $0x2ac] ss:$16 sps:$4 sm:$0xff]   ;;  %v3524_v26 = vld [vmem:[%s5032_s23 + $0x2a0] ss:$16 sps:$4 sm:$0xff]   ;;  %v3527_v27 = vld [vmem:[%s5032_s23 + $0x2a8] ss:$16 sps:$4 sm:$0xff]  }
  0x26   :  { %1297 = vmatpush1.bf16.msra.mxu0 %v3444_v30  ;;  %1461 = vmatpush1.bf16.msra.mxu1 %v3445_v31  ;;  %v3532_v28 = vld [vmem:[%s5032_s23 + $0x2c4] ss:$16 sps:$4 sm:$0xff]   ;;  %v3535_v29 = vld [vmem:[%s5032_s23 + $0x2cc] ss:$16 sps:$4 sm:$0xff]   ;;  %v3530_v31 = vld [vmem:[%s5032_s23 + $0x2c0] ss:$16 sps:$4 sm:$0xff]  }
  0x27   :  { %1298 = vmatprep.subr.bf16.mxu0 %v3446_v32  ;;  %1462 = vmatprep.subr.bf16.mxu1 %v3448_v33  ;;  %v69_v30 = vld [vmem:[%s5033_s29 + $0x18] sm:$0xff]  ;;  %v3556_v46 = vld [vmem:[%s5032_s23 + $0x344] ss:$16 sps:$4 sm:$0xff]   ;;  %v3554_v48 = vld [vmem:[%s5032_s23 + $0x340] ss:$16 sps:$4 sm:$0xff]  }
  0x28   :  { %v272_v32 = vpack.c.bf16 %v69_v30, %v69_v30  ;;  %v3533_v33 = vld [vmem:[%s5032_s23 + $0x2c8] ss:$16 sps:$4 sm:$0xff]   ;;  %v3586_v2 = vld [vmem:[%s5032_s23 + $0x3e4] ss:$16 sps:$4 sm:$0xff]  }
  0x29   :  { %v3622_v30 = vld [vmem:[%s5032_s23 + $0x4a4] ss:$16 sps:$4 sm:$0xff]  }
  0x2a   :  { %1299 = vmatpush1.bf16.msra.mxu0 %v3450_v34  ;;  %1463 = vmatpush1.bf16.msra.mxu1 %v3451_v35  ;;  %v3538_v34 = vld [vmem:[%s5032_s23 + $0x2e4] ss:$16 sps:$4 sm:$0xff]   ;;  %v3541_v35 = vld [vmem:[%s5032_s23 + $0x2ec] ss:$16 sps:$4 sm:$0xff]  }
  0x2b   :  { %1300 = vmatprep.subr.bf16.mxu0 %v3452_v36  ;;  %1464 = vmatprep.subr.bf16.mxu1 %v3454_v37  ;;  %v3536_v36 = vld [vmem:[%s5032_s23 + $0x2e0] ss:$16 sps:$4 sm:$0xff]   ;;  %v3539_v37 = vld [vmem:[%s5032_s23 + $0x2e8] ss:$16 sps:$4 sm:$0xff]  }
  0x2e   :  { %1301 = vmatpush1.bf16.msra.mxu0 %v3456_v38  ;;  %1465 = vmatpush1.bf16.msra.mxu1 %v3457_v39  ;;  %v3544_v38 = vld [vmem:[%s5032_s23 + $0x304] ss:$16 sps:$4 sm:$0xff]   ;;  %v3547_v39 = vld [vmem:[%s5032_s23 + $0x30c] ss:$16 sps:$4 sm:$0xff]  }
  0x2f   :  { %1302 = vmatprep.subr.bf16.mxu0 %v3458_v40  ;;  %1466 = vmatprep.subr.bf16.mxu1 %v3460_v41  ;;  %v3542_v40 = vld [vmem:[%s5032_s23 + $0x300] ss:$16 sps:$4 sm:$0xff]   ;;  %v3545_v41 = vld [vmem:[%s5032_s23 + $0x308] ss:$16 sps:$4 sm:$0xff]  }
  0x32   :  { %1303 = vmatpush1.bf16.msra.mxu0 %v3462_v42  ;;  %1467 = vmatpush1.bf16.msra.mxu1 %v3463_v43  ;;  %v3550_v42 = vld [vmem:[%s5032_s23 + $0x324] ss:$16 sps:$4 sm:$0xff]   ;;  %v3553_v43 = vld [vmem:[%s5032_s23 + $0x32c] ss:$16 sps:$4 sm:$0xff]  }
  0x33   :  { %1304 = vmatprep.subr.bf16.mxu0 %v3464_v44  ;;  %1468 = vmatprep.subr.bf16.mxu1 %v3466_v45  ;;  %v3548_v44 = vld [vmem:[%s5032_s23 + $0x320] ss:$16 sps:$4 sm:$0xff]   ;;  %v3551_v45 = vld [vmem:[%s5032_s23 + $0x328] ss:$16 sps:$4 sm:$0xff]  }
  0x36   :  { %1305 = vmatpush1.bf16.msra.mxu0 %v3468_v47  ;;  %1469 = vmatpush1.bf16.msra.mxu1 %v3469_v49  ;;  %v3559_v47 = vld [vmem:[%s5032_s23 + $0x34c] ss:$16 sps:$4 sm:$0xff]   ;;  %v3557_v49 = vld [vmem:[%s5032_s23 + $0x348] ss:$16 sps:$4 sm:$0xff]  }
  0x37   :  { %1306 = vmatprep.subr.bf16.mxu0 %v3470_v50  ;;  %1470 = vmatprep.subr.bf16.mxu1 %v3472_v51  ;;  %v3562_v50 = vld [vmem:[%s5032_s23 + $0x364] ss:$16 sps:$4 sm:$0xff]   ;;  %v3565_v51 = vld [vmem:[%s5032_s23 + $0x36c] ss:$16 sps:$4 sm:$0xff]  }
  0x3a   :  { %1307 = vmatpush1.bf16.msra.mxu0 %v3474_v52  ;;  %1471 = vmatpush1.bf16.msra.mxu1 %v3475_v53  ;;  %v3560_v52 = vld [vmem:[%s5032_s23 + $0x360] ss:$16 sps:$4 sm:$0xff]   ;;  %v3563_v53 = vld [vmem:[%s5032_s23 + $0x368] ss:$16 sps:$4 sm:$0xff]  }
  0x3b   :  { %1308 = vmatprep.subr.bf16.mxu0 %v3476_v54  ;;  %1472 = vmatprep.subr.bf16.mxu1 %v3478_v55  ;;  %v3568_v54 = vld [vmem:[%s5032_s23 + $0x384] ss:$16 sps:$4 sm:$0xff]   ;;  %v3571_v55 = vld [vmem:[%s5032_s23 + $0x38c] ss:$16 sps:$4 sm:$0xff]  }
  0x3e   :  { %1309 = vmatpush1.bf16.msra.mxu0 %v3480_v56  ;;  %1473 = vmatpush1.bf16.msra.mxu1 %v3481_v57  ;;  %v3566_v56 = vld [vmem:[%s5032_s23 + $0x380] ss:$16 sps:$4 sm:$0xff]   ;;  %v3569_v57 = vld [vmem:[%s5032_s23 + $0x388] ss:$16 sps:$4 sm:$0xff]  }
  0x3f   :  { %1310 = vmatprep.subr.bf16.mxu0 %v3482_v58  ;;  %1474 = vmatprep.subr.bf16.mxu1 %v3484_v59  ;;  %v3574_v58 = vld [vmem:[%s5032_s23 + $0x3a4] ss:$16 sps:$4 sm:$0xff]   ;;  %v3577_v59 = vld [vmem:[%s5032_s23 + $0x3ac] ss:$16 sps:$4 sm:$0xff]  }
  0x42   :  { %1311 = vmatpush1.bf16.msra.mxu0 %v3486_v60  ;;  %1475 = vmatpush1.bf16.msra.mxu1 %v3487_v61  ;;  %v3572_v60 = vld [vmem:[%s5032_s23 + $0x3a0] ss:$16 sps:$4 sm:$0xff]   ;;  %v3575_v61 = vld [vmem:[%s5032_s23 + $0x3a8] ss:$16 sps:$4 sm:$0xff]  }
  0x43   :  { %1312 = vmatprep.subr.bf16.mxu0 %v3488_v62  ;;  %1476 = vmatprep.subr.bf16.mxu1 %v3490_v63  ;;  %v3580_v62 = vld [vmem:[%s5032_s23 + $0x3c4] ss:$16 sps:$4 sm:$0xff]   ;;  %v3583_v63 = vld [vmem:[%s5032_s23 + $0x3cc] ss:$16 sps:$4 sm:$0xff]  }
  0x46   :  { %1313 = vmatpush1.bf16.msra.mxu0 %v3492_v0  ;;  %1477 = vmatpush1.bf16.msra.mxu1 %v3493_v1  ;;  %v3578_v0 = vld [vmem:[%s5032_s23 + $0x3c0] ss:$16 sps:$4 sm:$0xff]   ;;  %v3581_v1 = vld [vmem:[%s5032_s23 + $0x3c8] ss:$16 sps:$4 sm:$0xff]  }
  0x47   :  { %1323 = vmatprep.subr.bf16.mxu0 %v3496_v3  ;;  %1487 = vmatprep.subr.bf16.mxu1 %v3499_v4  ;;  %v3589_v3 = vld [vmem:[%s5032_s23 + $0x3ec] ss:$16 sps:$4 sm:$0xff]   ;;  %v3584_v4 = vld [vmem:[%s5032_s23 + $0x3e0] ss:$16 sps:$4 sm:$0xff]  }
  0x49   :  { %1315 = vmatmul.mubr.bf16.vlgmr.msra.gmra.mrb[0].mxu0 %v269_v5  ;;  %1479 = vmatmul.mubr.bf16.vlgmr.msra.gmra.mrb[0].mxu1 %v269_v5  ;;  %v3587_v5 = vld [vmem:[%s5032_s23 + $0x3e8] ss:$16 sps:$4 sm:$0xff]  }
  0x4a   :  { %1324 = vmatpush1.bf16.msra.mxu0 %v3494_v6  ;;  %1488 = vmatpush1.bf16.msra.mxu1 %v3497_v7  ;;  %v3592_v6 = vld [vmem:[%s5032_s23 + $0x404] ss:$16 sps:$4 sm:$0xff]  }
  0x4b   :  { %1325 = vmatprep.subr.bf16.mxu0 %v3502_v8  ;;  %1489 = vmatprep.subr.bf16.mxu1 %v3505_v9  ;;  %v68_v7 = vld [vmem:[%s5033_s29 + $0x10] sm:$0xff]  ;;  %v3595_v8 = vld [vmem:[%s5032_s23 + $0x40c] ss:$16 sps:$4 sm:$0xff]  }
  0x4c   :  { %1355 = vmatprep.mubr.bf16.mxu0 %v272_v32  ;;  %1519 = vmatprep.mubr.bf16.mxu1 %v272_v32  ;;  %v3590_v9 = vld [vmem:[%s5032_s23 + $0x400] ss:$16 sps:$4 sm:$0xff]  }
  0x4d   :  { %v3620_v32 = vld [vmem:[%s5032_s23 + $0x4a0] ss:$16 sps:$4 sm:$0xff]  }
  0x4e   :  { %1326 = vmatpush1.bf16.msra.mxu0 %v3500_v10  ;;  %1490 = vmatpush1.bf16.msra.mxu1 %v3503_v11  ;;  %v271_v10 = vpack.c.bf16 %v68_v7, %v68_v7  ;;  %v3593_v11 = vld [vmem:[%s5032_s23 + $0x408] ss:$16 sps:$4 sm:$0xff]   ;;  %v3685_v7 = vld [vmem:[%s5032_s23 + $0x5ec] ss:$16 sps:$4 sm:$0xff]  }
  0x4f   :  { %1327 = vmatprep.subr.bf16.mxu0 %v3508_v12  ;;  %1491 = vmatprep.subr.bf16.mxu1 %v3511_v13  ;;  %v3598_v12 = vld [vmem:[%s5032_s23 + $0x424] ss:$16 sps:$4 sm:$0xff]   ;;  %v3601_v13 = vld [vmem:[%s5032_s23 + $0x42c] ss:$16 sps:$4 sm:$0xff]  }
  0x52   :  { %1328 = vmatpush1.bf16.msra.mxu0 %v3506_v14  ;;  %1492 = vmatpush1.bf16.msra.mxu1 %v3509_v15  ;;  %v71_v14 = vld [vmem:[%s5033_s29 + $0x28] sm:$0xff] }
  0x53   :  { %1329 = vmatprep.subr.bf16.mxu0 %v3514_v16  ;;  %1493 = vmatprep.subr.bf16.mxu1 %v3517_v17  ;;  %v274_v15 = vpack.c.bf16 %v71_v14, %v71_v14  ;;  %v3596_v16 = vld [vmem:[%s5032_s23 + $0x420] ss:$16 sps:$4 sm:$0xff]   ;;  %v3599_v17 = vld [vmem:[%s5032_s23 + $0x428] ss:$16 sps:$4 sm:$0xff]  }
  0x54   :  { %v3686_v14 = vld [vmem:[%s5032_s23 + $0x600] ss:$16 sps:$4 sm:$0xff]  }
  0x56   :  { %1330 = vmatpush1.bf16.msra.mxu0 %v3512_v18  ;;  %1494 = vmatpush1.bf16.msra.mxu1 %v3515_v19  ;;  %v3604_v18 = vld [vmem:[%s5032_s23 + $0x444] ss:$16 sps:$4 sm:$0xff]   ;;  %v3607_v19 = vld [vmem:[%s5032_s23 + $0x44c] ss:$16 sps:$4 sm:$0xff]  }
  0x57   :  { %1331 = vmatprep.subr.bf16.mxu0 %v3520_v20  ;;  %1495 = vmatprep.subr.bf16.mxu1 %v3523_v21  ;;  %v3602_v20 = vld [vmem:[%s5032_s23 + $0x440] ss:$16 sps:$4 sm:$0xff]   ;;  %v3605_v21 = vld [vmem:[%s5032_s23 + $0x448] ss:$16 sps:$4 sm:$0xff]  }
  0x5a   :  { %1332 = vmatpush1.bf16.msra.mxu0 %v3518_v22  ;;  %1496 = vmatpush1.bf16.msra.mxu1 %v3521_v23  ;;  %v3610_v22 = vld [vmem:[%s5032_s23 + $0x464] ss:$16 sps:$4 sm:$0xff]   ;;  %v3613_v23 = vld [vmem:[%s5032_s23 + $0x46c] ss:$16 sps:$4 sm:$0xff]  }
  0x5b   :  { %1333 = vmatprep.subr.bf16.mxu0 %v3526_v24  ;;  %1497 = vmatprep.subr.bf16.mxu1 %v3529_v25  ;;  %v3608_v24 = vld [vmem:[%s5032_s23 + $0x460] ss:$16 sps:$4 sm:$0xff]   ;;  %v3611_v25 = vld [vmem:[%s5032_s23 + $0x468] ss:$16 sps:$4 sm:$0xff]  }
  0x5e   :  { %1334 = vmatpush1.bf16.msra.mxu0 %v3524_v26  ;;  %1498 = vmatpush1.bf16.msra.mxu1 %v3527_v27  ;;  %v3616_v26 = vld [vmem:[%s5032_s23 + $0x484] ss:$16 sps:$4 sm:$0xff]   ;;  %v3619_v27 = vld [vmem:[%s5032_s23 + $0x48c] ss:$16 sps:$4 sm:$0xff]  }
  0x5f   :  { %1335 = vmatprep.subr.bf16.mxu0 %v3532_v28  ;;  %1499 = vmatprep.subr.bf16.mxu1 %v3535_v29  ;;  %v3614_v28 = vld [vmem:[%s5032_s23 + $0x480] ss:$16 sps:$4 sm:$0xff]   ;;  %v3617_v29 = vld [vmem:[%s5032_s23 + $0x488] ss:$16 sps:$4 sm:$0xff]  }
  0x62   :  { %1336 = vmatpush1.bf16.msra.mxu0 %v3530_v31  ;;  %1500 = vmatpush1.bf16.msra.mxu1 %v3533_v33  ;;  %v3625_v31 = vld [vmem:[%s5032_s23 + $0x4ac] ss:$16 sps:$4 sm:$0xff]   ;;  %v3623_v33 = vld [vmem:[%s5032_s23 + $0x4a8] ss:$16 sps:$4 sm:$0xff]  }
  0x63   :  { %1337 = vmatprep.subr.bf16.mxu0 %v3538_v34  ;;  %1501 = vmatprep.subr.bf16.mxu1 %v3541_v35  ;;  %v3628_v34 = vld [vmem:[%s5032_s23 + $0x4c4] ss:$16 sps:$4 sm:$0xff]   ;;  %v3631_v35 = vld [vmem:[%s5032_s23 + $0x4cc] ss:$16 sps:$4 sm:$0xff]  }
  0x66   :  { %1338 = vmatpush1.bf16.msra.mxu0 %v3536_v36  ;;  %1502 = vmatpush1.bf16.msra.mxu1 %v3539_v37  ;;  %v3626_v36 = vld [vmem:[%s5032_s23 + $0x4c0] ss:$16 sps:$4 sm:$0xff]   ;;  %v3629_v37 = vld [vmem:[%s5032_s23 + $0x4c8] ss:$16 sps:$4 sm:$0xff]  }
  0x67   :  { %1339 = vmatprep.subr.bf16.mxu0 %v3544_v38  ;;  %1503 = vmatprep.subr.bf16.mxu1 %v3547_v39  ;;  %v3634_v38 = vld [vmem:[%s5032_s23 + $0x4e4] ss:$16 sps:$4 sm:$0xff]   ;;  %v3637_v39 = vld [vmem:[%s5032_s23 + $0x4ec] ss:$16 sps:$4 sm:$0xff]  }
  0x6a   :  { %1340 = vmatpush1.bf16.msra.mxu0 %v3542_v40  ;;  %1504 = vmatpush1.bf16.msra.mxu1 %v3545_v41  ;;  %v3632_v40 = vld [vmem:[%s5032_s23 + $0x4e0] ss:$16 sps:$4 sm:$0xff]   ;;  %v3635_v41 = vld [vmem:[%s5032_s23 + $0x4e8] ss:$16 sps:$4 sm:$0xff]  }
  0x6b   :  { %1341 = vmatprep.subr.bf16.mxu0 %v3550_v42  ;;  %1505 = vmatprep.subr.bf16.mxu1 %v3553_v43  ;;  %v3640_v42 = vld [vmem:[%s5032_s23 + $0x504] ss:$16 sps:$4 sm:$0xff]   ;;  %v3643_v43 = vld [vmem:[%s5032_s23 + $0x50c] ss:$16 sps:$4 sm:$0xff]  }
  0x6e   :  { %1342 = vmatpush1.bf16.msra.mxu0 %v3548_v44  ;;  %1506 = vmatpush1.bf16.msra.mxu1 %v3551_v45  ;;  %v3638_v44 = vld [vmem:[%s5032_s23 + $0x500] ss:$16 sps:$4 sm:$0xff]   ;;  %v3641_v45 = vld [vmem:[%s5032_s23 + $0x508] ss:$16 sps:$4 sm:$0xff]  }
  0x6f   :  { %1343 = vmatprep.subr.bf16.mxu0 %v3556_v46  ;;  %1507 = vmatprep.subr.bf16.mxu1 %v3559_v47  ;;  %v3646_v46 = vld [vmem:[%s5032_s23 + $0x524] ss:$16 sps:$4 sm:$0xff]   ;;  %v3649_v47 = vld [vmem:[%s5032_s23 + $0x52c] ss:$16 sps:$4 sm:$0xff]  }
  0x72   :  { %1344 = vmatpush1.bf16.msra.mxu0 %v3554_v48  ;;  %1508 = vmatpush1.bf16.msra.mxu1 %v3557_v49  ;;  %v3644_v48 = vld [vmem:[%s5032_s23 + $0x520] ss:$16 sps:$4 sm:$0xff]   ;;  %v3647_v49 = vld [vmem:[%s5032_s23 + $0x528] ss:$16 sps:$4 sm:$0xff]  }
  0x73   :  { %1345 = vmatprep.subr.bf16.mxu0 %v3562_v50  ;;  %1509 = vmatprep.subr.bf16.mxu1 %v3565_v51  ;;  %v3652_v50 = vld [vmem:[%s5032_s23 + $0x544] ss:$16 sps:$4 sm:$0xff]   ;;  %v3655_v51 = vld [vmem:[%s5032_s23 + $0x54c] ss:$16 sps:$4 sm:$0xff]  }
  0x76   :  { %1346 = vmatpush1.bf16.msra.mxu0 %v3560_v52  ;;  %1510 = vmatpush1.bf16.msra.mxu1 %v3563_v53  ;;  %v3650_v52 = vld [vmem:[%s5032_s23 + $0x540] ss:$16 sps:$4 sm:$0xff]   ;;  %v3653_v53 = vld [vmem:[%s5032_s23 + $0x548] ss:$16 sps:$4 sm:$0xff]  }
  0x77   :  { %1347 = vmatprep.subr.bf16.mxu0 %v3568_v54  ;;  %1511 = vmatprep.subr.bf16.mxu1 %v3571_v55  ;;  %v3658_v54 = vld [vmem:[%s5032_s23 + $0x564] ss:$16 sps:$4 sm:$0xff]   ;;  %v3661_v55 = vld [vmem:[%s5032_s23 + $0x56c] ss:$16 sps:$4 sm:$0xff]  }
  0x7a   :  { %1348 = vmatpush1.bf16.msra.mxu0 %v3566_v56  ;;  %1512 = vmatpush1.bf16.msra.mxu1 %v3569_v57  ;;  %v3656_v56 = vld [vmem:[%s5032_s23 + $0x560] ss:$16 sps:$4 sm:$0xff]   ;;  %v3659_v57 = vld [vmem:[%s5032_s23 + $0x568] ss:$16 sps:$4 sm:$0xff]  }
  0x7b   :  { %1349 = vmatprep.subr.bf16.mxu0 %v3574_v58  ;;  %1513 = vmatprep.subr.bf16.mxu1 %v3577_v59  ;;  %v3664_v58 = vld [vmem:[%s5032_s23 + $0x584] ss:$16 sps:$4 sm:$0xff]   ;;  %v3667_v59 = vld [vmem:[%s5032_s23 + $0x58c] ss:$16 sps:$4 sm:$0xff]  }
  0x7e   :  { %1350 = vmatpush1.bf16.msra.mxu0 %v3572_v60  ;;  %1514 = vmatpush1.bf16.msra.mxu1 %v3575_v61  ;;  %v3662_v60 = vld [vmem:[%s5032_s23 + $0x580] ss:$16 sps:$4 sm:$0xff]   ;;  %v3665_v61 = vld [vmem:[%s5032_s23 + $0x588] ss:$16 sps:$4 sm:$0xff]  }
  0x7f   :  { %1351 = vmatprep.subr.bf16.mxu0 %v3580_v62  ;;  %1515 = vmatprep.subr.bf16.mxu1 %v3583_v63  ;;  %v3670_v62 = vld [vmem:[%s5032_s23 + $0x5a4] ss:$16 sps:$4 sm:$0xff]   ;;  %v3673_v63 = vld [vmem:[%s5032_s23 + $0x5ac] ss:$16 sps:$4 sm:$0xff]  }
  0x82   :  { %1352 = vmatpush1.bf16.msra.mxu0 %v3578_v0  ;;  %1516 = vmatpush1.bf16.msra.mxu1 %v3581_v1  ;;  %v3668_v0 = vld [vmem:[%s5032_s23 + $0x5a0] ss:$16 sps:$4 sm:$0xff]   ;;  %v3671_v1 = vld [vmem:[%s5032_s23 + $0x5a8] ss:$16 sps:$4 sm:$0xff]  }
  0x83   :  { %1353 = vmatprep.subr.bf16.mxu0 %v3586_v2  ;;  %1517 = vmatprep.subr.bf16.mxu1 %v3589_v3  ;;  %v3676_v2 = vld [vmem:[%s5032_s23 + $0x5c4] ss:$16 sps:$4 sm:$0xff]   ;;  %v3679_v3 = vld [vmem:[%s5032_s23 + $0x5cc] ss:$16 sps:$4 sm:$0xff]  }
  0x86   :  { %1354 = vmatpush1.bf16.msra.mxu0 %v3584_v4  ;;  %1518 = vmatpush1.bf16.msra.mxu1 %v3587_v5  ;;  %v3674_v4 = vld [vmem:[%s5032_s23 + $0x5c0] ss:$16 sps:$4 sm:$0xff]   ;;  %v3677_v5 = vld [vmem:[%s5032_s23 + $0x5c8] ss:$16 sps:$4 sm:$0xff]  }
  0x87   :  { %1364 = vmatprep.subr.bf16.mxu0 %v3592_v6  ;;  %1528 = vmatprep.subr.bf16.mxu1 %v3595_v8  ;;  %v3682_v6 = vld [vmem:[%s5032_s23 + $0x5e4] ss:$16 sps:$4 sm:$0xff]   ;;  %v3680_v8 = vld [vmem:[%s5032_s23 + $0x5e0] ss:$16 sps:$4 sm:$0xff]  }
  0x89   :  { %1356 = vmatmul.mubr.bf16.vlgmr.msra.gmra.mrb[0].mxu0 %v271_v10  ;;  %1520 = vmatmul.mubr.bf16.vlgmr.msra.gmra.mrb[0].mxu1 %v271_v10  ;;  %v70_v10 = vld [vmem:[%s5033_s29 + $0x20] sm:$0xff] }
  0x8a   :  { %1365 = vmatpush1.bf16.msra.mxu0 %v3590_v9  ;;  %1529 = vmatpush1.bf16.msra.mxu1 %v3593_v11  ;;  %v3683_v9 = vld [vmem:[%s5032_s23 + $0x5e8] ss:$16 sps:$4 sm:$0xff]   ;;  %v3688_v11 = vld [vmem:[%s5032_s23 + $0x604] ss:$16 sps:$4 sm:$0xff]  }
  0x8b   :  { %1366 = vmatprep.subr.bf16.mxu0 %v3598_v12  ;;  %1530 = vmatprep.subr.bf16.mxu1 %v3601_v13  ;;  %v3691_v12 = vld [vmem:[%s5032_s23 + $0x60c] ss:$16 sps:$4 sm:$0xff]   ;;  %v273_v13 = vpack.c.bf16 %v70_v10, %v70_v10 }
  0x8c   :  { %1396 = vmatprep.mubr.bf16.mxu0 %v274_v15  ;;  %1560 = vmatprep.mubr.bf16.mxu1 %v274_v15  ;;  %v3689_v15 = vld [vmem:[%s5032_s23 + $0x608] ss:$16 sps:$4 sm:$0xff]  }
  0x8e   :  { %1367 = vmatpush1.bf16.msra.mxu0 %v3596_v16  ;;  %1531 = vmatpush1.bf16.msra.mxu1 %v3599_v17  ;;  %v3692_v16 = vld [vmem:[%s5034_s30 + $0x40] sm:$0xff]  }
  0x8f   :  { %1368 = vmatprep.subr.bf16.mxu0 %v3604_v18  ;;  %1532 = vmatprep.subr.bf16.mxu1 %v3607_v19  ;;  %v3693_v17 = vld [vmem:[%s5034_s30 + $0xc0] sm:$0xff]   ;;  %v3820_v18 = vmov 0   ;;  %v72_v19 = vld [vmem:[%s5033_s29 + $0x30] sm:$0xff]  ;;  %s5036_s29 = sld [smem:[#allocation6_spill]] }
  0x92   :  { %1369 = vmatpush1.bf16.msra.mxu0 %v3602_v20  ;;  %1533 = vmatpush1.bf16.msra.mxu1 %v3605_v21  ;;  %v275_v20 = vpack.c.bf16 %v72_v19, %v72_v19  ;;  %v3694_v21 = vld [vmem:[%s5034_s30] sm:$0xff]   ;;  %v3821_v19 = vmov 0.0|0.0  }
  0x93   :  { %1370 = vmatprep.subr.bf16.mxu0 %v3610_v22  ;;  %1534 = vmatprep.subr.bf16.mxu1 %v3613_v23  ;;  %v3695_v22 = vld [vmem:[%s5034_s30 + $0x80] sm:$0xff]   ;;  %v3696_v23 = vld [vmem:[%s5034_s30 + $0x48] sm:$0xff]  }
  0x96   :  { %1371 = vmatpush1.bf16.msra.mxu0 %v3608_v24  ;;  %1535 = vmatpush1.bf16.msra.mxu1 %v3611_v25  ;;  %v3697_v24 = vld [vmem:[%s5034_s30 + $0xc8] sm:$0xff]  }
  0x97   :  { %1372 = vmatprep.subr.bf16.mxu0 %v3616_v26  ;;  %1536 = vmatprep.subr.bf16.mxu1 %v3619_v27  ;;  %v3698_v25 = vld [vmem:[%s5034_s30 + $0x8] sm:$0xff]   ;;  %v3700_v27 = vld [vmem:[%s5034_s30 + $0x50] sm:$0xff]  }
  0x98   :  { %v3699_v26 = vld [vmem:[%s5034_s30 + $0x88] sm:$0xff]  }
  0x9a   :  { %1373 = vmatpush1.bf16.msra.mxu0 %v3614_v28  ;;  %1537 = vmatpush1.bf16.msra.mxu1 %v3617_v29  ;;  %v3701_v28 = vld [vmem:[%s5034_s30 + $0xd0] sm:$0xff]  }
  0x9b   :  { %1374 = vmatprep.subr.bf16.mxu0 %v3622_v30  ;;  %1538 = vmatprep.subr.bf16.mxu1 %v3625_v31  ;;  %v3702_v29 = vld [vmem:[%s5034_s30 + $0x10] sm:$0xff]   ;;  %v3704_v31 = vld [vmem:[%s5034_s30 + $0x58] sm:$0xff]  }
  0x9c   :  { %v3703_v30 = vld [vmem:[%s5034_s30 + $0x90] sm:$0xff]  }
  0x9e   :  { %1375 = vmatpush1.bf16.msra.mxu0 %v3620_v32  ;;  %1539 = vmatpush1.bf16.msra.mxu1 %v3623_v33  ;;  %v3705_v32 = vld [vmem:[%s5034_s30 + $0xd8] sm:$0xff]  }
  0x9f   :  { %1376 = vmatprep.subr.bf16.mxu0 %v3628_v34  ;;  %1540 = vmatprep.subr.bf16.mxu1 %v3631_v35  ;;  %v3706_v33 = vld [vmem:[%s5034_s30 + $0x18] sm:$0xff]   ;;  %v3708_v35 = vld [vmem:[%s5034_s30 + $0x60] sm:$0xff]  }
  0xa0   :  { %v3707_v34 = vld [vmem:[%s5034_s30 + $0x98] sm:$0xff]  }
  0xa2   :  { %1377 = vmatpush1.bf16.msra.mxu0 %v3626_v36  ;;  %1541 = vmatpush1.bf16.msra.mxu1 %v3629_v37  ;;  %v3709_v36 = vld [vmem:[%s5034_s30 + $0xe0] sm:$0xff]  }
  0xa3   :  { %1378 = vmatprep.subr.bf16.mxu0 %v3634_v38  ;;  %1542 = vmatprep.subr.bf16.mxu1 %v3637_v39  ;;  %v3710_v37 = vld [vmem:[%s5034_s30 + $0x20] sm:$0xff]   ;;  %v3712_v39 = vld [vmem:[%s5034_s30 + $0x68] sm:$0xff]  }
  0xa4   :  { %v3711_v38 = vld [vmem:[%s5034_s30 + $0xa0] sm:$0xff]  }
  0xa6   :  { %1379 = vmatpush1.bf16.msra.mxu0 %v3632_v40  ;;  %1543 = vmatpush1.bf16.msra.mxu1 %v3635_v41  ;;  %v3713_v40 = vld [vmem:[%s5034_s30 + $0xe8] sm:$0xff]  }
  0xa7   :  { %1380 = vmatprep.subr.bf16.mxu0 %v3640_v42  ;;  %1544 = vmatprep.subr.bf16.mxu1 %v3643_v43  ;;  %v3714_v41 = vld [vmem:[%s5034_s30 + $0x28] sm:$0xff]   ;;  %v3716_v43 = vld [vmem:[%s5034_s30 + $0x70] sm:$0xff]  }
  0xa8   :  { %v3715_v42 = vld [vmem:[%s5034_s30 + $0xa8] sm:$0xff]  }
  0xaa   :  { %1381 = vmatpush1.bf16.msra.mxu0 %v3638_v44  ;;  %1545 = vmatpush1.bf16.msra.mxu1 %v3641_v45  ;;  %v3717_v44 = vld [vmem:[%s5034_s30 + $0xf0] sm:$0xff]  }
  0xab   :  { %1382 = vmatprep.subr.bf16.mxu0 %v3646_v46  ;;  %1546 = vmatprep.subr.bf16.mxu1 %v3649_v47  ;;  %v3718_v45 = vld [vmem:[%s5034_s30 + $0x30] sm:$0xff]   ;;  %v3720_v47 = vld [vmem:[%s5034_s30 + $0x78] sm:$0xff]  }
  0xac   :  { %v3719_v46 = vld [vmem:[%s5034_s30 + $0xb0] sm:$0xff]  }
  0xae   :  { %1383 = vmatpush1.bf16.msra.mxu0 %v3644_v48  ;;  %1547 = vmatpush1.bf16.msra.mxu1 %v3647_v49  ;;  %v3721_v48 = vld [vmem:[%s5034_s30 + $0xf8] sm:$0xff]  }
  0xaf   :  { %1384 = vmatprep.subr.bf16.mxu0 %v3652_v50  ;;  %1548 = vmatprep.subr.bf16.mxu1 %v3655_v51  ;;  %v3722_v49 = vld [vmem:[%s5034_s30 + $0x38] sm:$0xff]   ;;  %v278_v51 = vlaneseq }
  0xb0   :  { %v3723_v50 = vld [vmem:[%s5034_s30 + $0xb8] sm:$0xff]  }
  0xb2   :  { %1385 = vmatpush1.bf16.msra.mxu0 %v3650_v52  ;;  %1549 = vmatpush1.bf16.msra.mxu1 %v3653_v53  ;;  %v279_v52 = vshrl.u32 %v278_v51, 7  ;;  %v3734_v51 = vld [vmem:[%s5008_s10 + $0x10] sm:$0xff]  }
  0xb3   :  { %1386 = vmatprep.subr.bf16.mxu0 %v3658_v54  ;;  %1550 = vmatprep.subr.bf16.mxu1 %v3661_v55  ;;  %v276_v55 = vld [vmem:[%s5035_s27] sm:$0xf] }
  0xb4   :  { %v4640_v53 = vsub.s32 0, %v279_v52  ;;  %v288_v54 = vsub.s32 2, %v279_v52 }
  0xb6   :  { %1387 = vmatpush1.bf16.msra.mxu0 %v3656_v56  ;;  %1551 = vmatpush1.bf16.msra.mxu1 %v3659_v57  ;;  %v4645_v56 = vsub.s32 1, %v279_v52  ;;  %v292_v57 = vsub.s32 3, %v279_v52  ;;  %v3735_v52 = vld [vmem:[%s5008_s10 + $0x58] sm:$0xff]  }
  0xb7   :  { %1388 = vmatprep.subr.bf16.mxu0 %v3664_v58  ;;  %1552 = vmatprep.subr.bf16.mxu1 %v3667_v59  ;;  %v281_v58 = vrot.slane %v276_v55, %v4640_v53  ;;  %v289_v59 = vrot.slane %v276_v55, %v288_v54  ;;  %v3736_v54 = vld [vmem:[%s5008_s10 + $0x18] sm:$0xff]  }
  0xba   :  { %1389 = vmatpush1.bf16.msra.mxu0 %v3662_v60  ;;  %1553 = vmatpush1.bf16.msra.mxu1 %v3665_v61  ;;  %v285_v60 = vrot.slane %v276_v55, %v4645_v56  ;;  %v293_v61 = vrot.slane %v276_v55, %v292_v57  ;;  %v3737_v55 = vld [vmem:[%s5008_s10 + $0x60] sm:$0xff]  }
  0xbb   :  { %1390 = vmatprep.subr.bf16.mxu0 %v3670_v62  ;;  %1554 = vmatprep.subr.bf16.mxu1 %v3673_v63  ;;  %v3738_v57 = vld [vmem:[%s5008_s10 + $0x20] sm:$0xff]  }
  0xbe   :  { %1391 = vmatpush1.bf16.msra.mxu0 %v3668_v0  ;;  %1555 = vmatpush1.bf16.msra.mxu1 %v3671_v1 }
  0xbf   :  { %1392 = vmatprep.subr.bf16.mxu0 %v3676_v2  ;;  %1556 = vmatprep.subr.bf16.mxu1 %v3679_v3 }
  0xc2   :  { %1393 = vmatpush1.bf16.msra.mxu0 %v3674_v4  ;;  %1557 = vmatpush1.bf16.msra.mxu1 %v3677_v5 }
  0xc3   :  { %1394 = vmatprep.subr.bf16.mxu0 %v3682_v6  ;;  %1558 = vmatprep.subr.bf16.mxu1 %v3685_v7 }
  0xc6   :  { %1395 = vmatpush1.bf16.msra.mxu0 %v3680_v8  ;;  %1559 = vmatpush1.bf16.msra.mxu1 %v3683_v9 }
  0xc7   :  { %1405 = vmatprep.subr.bf16.mxu0 %v3688_v11  ;;  %1569 = vmatprep.subr.bf16.mxu1 %v3691_v12 }
  0xc9   :  { %1397 = vmatmul.mubr.bf16.vlgmr.msra.gmra.mrb[0].mxu0 %v273_v13  ;;  %1561 = vmatmul.mubr.bf16.vlgmr.msra.gmra.mrb[0].mxu1 %v273_v13 }
  0xca   :  { %1406 = vmatpush1.bf16.msra.mxu0 %v3686_v14  ;;  %1570 = vmatpush1.bf16.msra.mxu1 %v3689_v15 }
  0xcb   :  { %1437 = vmatprep.mubr.bf16.mxu0 %v3820_v18  ;;  %1601 = vmatprep.mubr.bf16.mxu1 %v3820_v18 }
  0xcc   :  { %3129 = vmatprep.subr.bf16.mxu0 %v3692_v16  ;;  %3151 = vmatprep.subr.bf16.mxu1 %v3693_v17 }
  0xd5   :  { %3047 = vmatmul.mubr.msk.bf16.vlgmr.msra.gmra.mrb[0].mxu0 %vm1278_vm0, %v275_v20  ;;  %3048 = vmatmul.mubr.msk.bf16.vlgmr.msra.gmra.mrb[0].mxu1 %vm1278_vm0, %v275_v20  ;;  %v3724_v20 = vld [vmem:[%s5036_s29] ss:$8 sps:$4 sm:$0xff]  }
  0xd6   :  { %3130 = vmatpush3.bf16.msra.mxu0 %v3694_v21  ;;  %3152 = vmatpush3.bf16.msra.mxu1 %v3695_v22  ;;  %v3726_v21 = vld [vmem:[%s5036_s29 + $0x4] ss:$8 sps:$4 sm:$0xff]  }
  0xd7   :  { %3131 = vmatprep.subr.bf16.mxu0 %v3696_v23  ;;  %3153 = vmatprep.subr.bf16.mxu1 %v3697_v24  ;;  %v1962_v22 = vld [vmem:[%s5007_s6] sm:$0xff]  ;;  %v1963_v23 = vld [vmem:[%s5007_s6 + $0x8] sm:$0xff]  ;;  %v3823_v24 = vmov 0.0  }
  0xd8   :  { %2832 = vst [vmem:[%s5022_s20] sm:$0xff] %v3823_v24 }
  0xda   :  { %3132 = vmatpush3.bf16.msra.mxu0 %v3698_v25  ;;  %3154 = vmatpush3.bf16.msra.mxu1 %v3699_v26  ;;  %v3304_v25 = vpack.c.bf16 %v1963_v23, %v1962_v22  ;;  %v2070_v26 = vld [vmem:[%s5036_s29 + $0x10] sm:$0x33] }
  0xdb   :  { %3133 = vmatprep.subr.bf16.mxu0 %v3700_v27  ;;  %3155 = vmatprep.subr.bf16.mxu1 %v3701_v28  ;;  %v3088_v27 = vcombine.high %v2070_v26, %v2070_v26  ;;  %v3087_v28 = vcombine.low %v2070_v26, %v2070_v26 }
  0xde   :  { %3134 = vmatpush3.bf16.msra.mxu0 %v3702_v29  ;;  %3156 = vmatpush3.bf16.msra.mxu1 %v3703_v30  ;;  %v1964_v29 = vld [vmem:[%s5007_s6 + $0x10] sm:$0xf]  ;;  %v2104_v30 = vsel %vm2102_vm2, %v3087_v28, 0 }
  0xdf   :  { %3135 = vmatprep.subr.bf16.mxu0 %v3704_v31  ;;  %3157 = vmatprep.subr.bf16.mxu1 %v3705_v32  ;;  %v3729_v31 = vld [vmem:[%s5008_s10 + $0x40] sm:$0xff]  }
  0xe2   :  { %3136 = vmatpush3.bf16.msra.mxu0 %v3706_v33  ;;  %3158 = vmatpush3.bf16.msra.mxu1 %v3707_v34  ;;  %v3049_v34 = vld [vmem:[%s5009_s5] ss:$0 sm:$0xff] }
  0xe3   :  { %3137 = vmatprep.subr.bf16.mxu0 %v3708_v35  ;;  %3159 = vmatprep.subr.bf16.mxu1 %v3709_v36 }
  0xe6   :  { %3138 = vmatpush3.bf16.msra.mxu0 %v3710_v37  ;;  %3160 = vmatpush3.bf16.msra.mxu1 %v3711_v38 }
  0xe7   :  { %3139 = vmatprep.subr.bf16.mxu0 %v3712_v39  ;;  %3161 = vmatprep.subr.bf16.mxu1 %v3713_v40 }
  0xea   :  { %3140 = vmatpush3.bf16.msra.mxu0 %v3714_v41  ;;  %3162 = vmatpush3.bf16.msra.mxu1 %v3715_v42 }
  0xeb   :  { %3141 = vmatprep.subr.bf16.mxu0 %v3716_v43  ;;  %3163 = vmatprep.subr.bf16.mxu1 %v3717_v44 }
  0xee   :  { %3142 = vmatpush3.bf16.msra.mxu0 %v3718_v45  ;;  %3164 = vmatpush3.bf16.msra.mxu1 %v3719_v46  ;;  %v3730_v45 = vld [vmem:[%s5008_s10] sm:$0xff]   ;;  %v3731_v46 = vld [vmem:[%s5008_s10 + $0x48] sm:$0xff]  }
  0xef   :  { %3143 = vmatprep.subr.bf16.mxu0 %v3720_v47  ;;  %3165 = vmatprep.subr.bf16.mxu1 %v3721_v48 }
  0xf2   :  { %3144 = vmatpush3.bf16.msra.mxu0 %v3722_v49  ;;  %3166 = vmatpush3.bf16.msra.mxu1 %v3723_v50  ;;  %v3732_v49 = vld [vmem:[%s5008_s10 + $0x8] sm:$0xff]   ;;  %v3733_v50 = vld [vmem:[%s5008_s10 + $0x50] sm:$0xff]  }
  0xf3   :  { %3303 = vmatprep.subr.bf16.mxu0 %v3821_v19  ;;  %2109 = vmatprep.subr.bf16.mxu1 %v3726_v21 }
 0x1a8   :  { %v1439_v62 = vpop.f32.mrb[0].mxu0  ;;  %v1603_v63 = vpop.f32.mrb[0].mxu1 }
 0x1a9   :  { %v3362_v0 = vadd.f32 %v1439_v62, %v281_v58  ;;  %v3364_v1 = vadd.f32 %v1603_v63, %v289_v59  ;;  %v1441_v2 = vpop.f32.mrb[1].mxu0  ;;  %v1605_v3 = vpop.f32.mrb[1].mxu1  ;;  %v3739_v58 = vld [vmem:[%s5008_s10 + $0x68] sm:$0xff]   ;;  %v3743_v62 = vld [vmem:[%s5008_s10 + $0x78] sm:$0xff]  }
 0x1aa   :  { %v3363_v4 = vadd.f32 %v1441_v2, %v285_v60  ;;  %v3365_v5 = vadd.f32 %v1605_v3, %v293_v61  ;;  %v1443_v6 = vpop.f32.mrb[2].mxu0  ;;  %v1607_v7 = vpop.f32.mrb[2].mxu1  ;;  %v3740_v59 = vld [vmem:[%s5008_s10 + $0x28] sm:$0xff]   ;;  %v3741_v60 = vld [vmem:[%s5008_s10 + $0x70] sm:$0xff]   ;;  %v3744_v63 = vld [vmem:[%s5008_s10 + $0x38] sm:$0xff]  }
 0x1ab   :  { %3770 = vtanh.f32 %v3362_v0  ;;  %v1444_v8 = vpop.f32.mrb[3].mxu0  ;;  %v1608_v9 = vpop.f32.mrb[3].mxu1  ;;  %v3742_v61 = vld [vmem:[%s5008_s10 + $0x30] sm:$0xff]   ;;  %v2330_v0 = vld [vmem:[%s5010_s12] sm:$0xff]  ;;  %v2335_v7 = vld [vmem:[%s5010_s12 + $0x28] sm:$0xff] }
 0x1ac   :  { %3772 = vtanh.f32 %v3364_v1  ;;  %v2331_v1 = vld [vmem:[%s5010_s12 + $0x8] sm:$0xff]  ;;  %v2332_v2 = vld [vmem:[%s5010_s12 + $0x10] sm:$0xff]  ;;  %v2334_v6 = vld [vmem:[%s5010_s12 + $0x20] sm:$0xff] }
 0x1ad   :  { %3774 = vtanh.f32 %v3363_v4  ;;  %v3307_v3 = vpack.c.bf16 %v2331_v1, %v2330_v0  ;;  %v2333_v4 = vld [vmem:[%s5010_s12 + $0x18] sm:$0xff]  ;;  %v3313_v8 = vpack.c.bf16 %v2335_v7, %v2334_v6  ;;  %v2336_v9 = vld [vmem:[%s5010_s12 + $0x30] sm:$0xff] }
 0x1ae   :  { %3776 = vtanh.f32 %v3365_v5  ;;  %v3310_v5 = vpack.c.bf16 %v2333_v4, %v2332_v2 }
 0x1b5   :  { %v3771_v10 = vpop.eup %3770 }
 0x1b6   :  { %v3773_v11 = vpop.eup %3772  ;;  %v1678_v15 = vpack.c.bf16 %v3771_v10, %v3771_v10  ;;  %v2337_v10 = vld [vmem:[%s5010_s12 + $0x38] sm:$0xff] }
 0x1b7   :  { %v3775_v12 = vpop.eup %3774  ;;  %v1680_v17 = vpack.c.bf16 %v3773_v11, %v3773_v11  ;;  %v3316_v11 = vpack.c.bf16 %v2337_v10, %v2336_v9 }
 0x1b8   :  { %v3777_v13 = vpop.eup %3776  ;;  %v1679_v14 = vpack.c.bf16 %v3775_v12, %v3775_v12  ;;  %v2072_v12 = vld [vmem:[%s5011_s9] sm:$0x3] }
 0x1b9   :  { %v1681_v16 = vpack.c.bf16 %v3777_v13, %v3777_v13  ;;  %v2077_v13 = vrot.slane %v2072_v12, %v4640_v53 }
 0x1ba   :  { %1913 = vmatprep.mubr.bf16.mxu0 %v1679_v14 }
 0x1bb   :  { %1953 = vmatprep.mubr.bf16.mxu1 %v1681_v16  ;;  %1914 = vmatmul.mubr.bf16.vlgmr.msra.gmra.mrb[4].mxu0 %v1678_v15  ;;  %v2081_v15 = vrot.slane %v2072_v12, %v4645_v56  ;;  %v3746_v12 = vld [vmem:[%s5016_s16] ss:$8 sps:$4 sm:$0xff]  }
 0x1bc   :  { %1954 = vmatmul.mubr.bf16.vlgmr.msra.gmra.mrb[4].mxu1 %v1680_v17  ;;  %3259 = vmatprep.mubr.msk.f32.mxu0 %vm3822_vm1, %v3823_v24 }
 0x1bd   :  { %2141 = vmatprep.mubr.bf16.mxu1 %v3820_v18  ;;  %3305 = vmatpush3.bf16.msra.mxu0 %v3304_v25 }
 0x1be   :  { %2110 = vmatpush1.bf16.msra.mxu1 %v3724_v20  ;;  %3257 = vmatprep.subr.mxu0 %v3823_v24 }
 0x1bf   :  { %3089 = vmatprep.subr.msk.bf16.mxu1 %vm2102_vm2, %v3088_v27 }
 0x1c1   :  { %3258 = vmatpush3.msk.msra.mxu0 %vm1976_vm3, %v1964_v29 }
 0x1c2   :  { %2112 = vmatpush1.bf16.msra.mxu1 %v2104_v30  ;;  %3177 = vmatprep.subr.bf16.mxu0 %v3729_v31  ;;  %v2338_v30 = vld [vmem:[%s5010_s12 + $0x40] sm:$0xff]  ;;  %v2339_v31 = vld [vmem:[%s5010_s12 + $0x48] sm:$0xff] }
 0x1c3   :  { %3306 = vmatprep.subr.bf16.mxu1 %v3821_v19 }
 0x28e   :  { %v3145_v32 = vpop.f32.mrb[4].mxu0 }
 0x28f   :  { %v3167_v33 = vpop.f32.mrb[4].mxu1  ;;  %v3146_v35 = vpop.f32.mrb[5].mxu0 }
 0x290   :  { %v3147_v36 = vadd.f32 %v3146_v35, %v3145_v32  ;;  %v3168_v37 = vpop.f32.mrb[5].mxu1  ;;  %v3148_v38 = vpop.f32.mrb[6].mxu0  ;;  %v3319_v32 = vpack.c.bf16 %v2339_v31, %v2338_v30  ;;  %v2342_v35 = vld [vmem:[%s5010_s12 + $0x60] sm:$0xff] }
 0x291   :  { %v3169_v39 = vadd.f32 %v3168_v37, %v3167_v33  ;;  %v3170_v40 = vpop.f32.mrb[6].mxu1  ;;  %v3149_v41 = vpop.f32.mrb[7].mxu0  ;;  %v2340_v33 = vld [vmem:[%s5010_s12 + $0x50] sm:$0xff]  ;;  %v3760_v31 = vld [vmem:[%s5016_s16 + $0x44] ss:$8 sps:$4 sm:$0xff]  }
 0x292   :  { %v1916_v42 = vadd.f32 %v3147_v36, %v3049_v34  ;;  %v3171_v43 = vpop.f32.mrb[7].mxu1  ;;  %v2343_v36 = vld [vmem:[%s5010_s12 + $0x68] sm:$0xff]  ;;  %v2344_v38 = vld [vmem:[%s5010_s12 + $0x70] sm:$0xff]  ;;  %v2444_v41 = vld [vmem:[%s5012_s1] sm:$0xff] }
 0x293   :  { %v3325_v37 = vpack.c.bf16 %v2343_v36, %v2342_v35  ;;  %2446 = vrot.lane.b32.xlu0 %v2444_v41, %s3824_s3  ;;  %v3091_v43 = vld [vmem:[%s5013_s11] ss:$0 sm:$0xff]  ;;  %v3769_v36 = vld [vmem:[%s5016_s16 + $0x74] ss:$8 sps:$4 sm:$0xff]  }
 0x294   :  { %v1956_v44 = vadd.f32 %v3169_v39, %v1916_v42  ;;  %v2345_v39 = vld [vmem:[%s5010_s12 + $0x78] sm:$0xff]  ;;  %v3764_v35 = vld [vmem:[%s5016_s16 + $0x60] ss:$8 sps:$4 sm:$0xff]  }
 0x295   :  { %v3328_v40 = vpack.c.bf16 %v2345_v39, %v2344_v38  ;;  %v2690_v38 = vld [vmem:[%s5017_s18 + $0x80] sm:$0xff]  ;;  %v2691_v39 = vld [vmem:[%s5017_s18 + $0x88] sm:$0xff] }
 0x296   :  { %3778 = vtanh.f32 %v1956_v44  ;;  %v3330_v41 = vpack.c.bf16 %v2691_v39, %v2690_v38 }
 0x2a0   :  { %v3779_v47 = vpop.eup %3778 }
 0x2a1   :  { %3260 = vmatmul.mubr.msk.f32.vlgmr.msra.gmra.mrb[8].mxu0 %vm1972_vm4, %v3779_v47  ;;  %v2071_v48 = vpack.c.bf16 %v3779_v47, %v3779_v47 }
 0x2a2   :  { %3178 = vmatpush3.bf16.msra.mxu0 %v3730_v45 }
 0x2a3   :  { %3090 = vmatmul.mubr.msk.bf16.vlgmr.msra.gmra.mrb[8].mxu1 %vm1972_vm4, %v2071_v48  ;;  %3179 = vmatprep.subr.bf16.mxu0 %v3731_v46 }
 0x2a4   :  { %3294 = vmatprep.mubr.msk.f32.mxu1 %vm3822_vm1, %v3823_v24  ;;  %3308 = vmatpush3.bf16.msra.mxu1 %v3307_v3 }
 0x2a5   :  { %3309 = vmatprep.subr.bf16.mxu1 %v3821_v19 }
 0x2a6   :  { %3180 = vmatpush3.bf16.msra.mxu0 %v3732_v49  ;;  %v3745_v49 = vld [vmem:[%s5014_s14] sm:$0x1f]   ;;  %s3826_s14 = smov 108  }
 0x2a7   :  { %3181 = vmatprep.subr.bf16.mxu0 %v3733_v50  ;;  %v2479_v50 = vsel %vm2477_vm5, %v3745_v49, 0  ;;  %v2695_v49 = vld [vmem:[%s5017_s18 + $0xa8] sm:$0xff] }
 0x2a8   :  { %3311 = vmatpush3.bf16.msra.mxu1 %v3310_v5 }
 0x2a9   :  { %3312 = vmatprep.subr.bf16.mxu1 %v3821_v19 }
 0x2aa   :  { %3182 = vmatpush3.bf16.msra.mxu0 %v3734_v51  ;;  %v3108_v51 = vld [vmem:[%s5015_s13] ss:$0 sm:$0xff] }
 0x2ab   :  { %3183 = vmatprep.subr.bf16.mxu0 %v3735_v52 }
 0x2ac   :  { %3314 = vmatpush3.bf16.msra.mxu1 %v3313_v8 }
 0x2ad   :  { %3315 = vmatprep.subr.bf16.mxu1 %v3821_v19 }
 0x2ae   :  { %3184 = vmatpush3.bf16.msra.mxu0 %v3736_v54 }
 0x2af   :  { %3185 = vmatprep.subr.bf16.mxu0 %v3737_v55 }
 0x2b0   :  { %3317 = vmatpush3.bf16.msra.mxu1 %v3316_v11 }
 0x2b1   :  { %3318 = vmatprep.subr.bf16.mxu1 %v3821_v19 }
 0x2b2   :  { %3186 = vmatpush3.bf16.msra.mxu0 %v3738_v57 }
 0x2b3   :  { %3187 = vmatprep.subr.bf16.mxu0 %v3739_v58 }
 0x2b4   :  { %3320 = vmatpush3.bf16.msra.mxu1 %v3319_v32  ;;  %v3758_v32 = vld [vmem:[%s5016_s16 + $0x40] ss:$8 sps:$4 sm:$0xff]  }
 0x2b5   :  { %3321 = vmatprep.subr.bf16.mxu1 %v3821_v19 }
 0x2b6   :  { %3188 = vmatpush3.bf16.msra.mxu0 %v3740_v59 }
 0x2b7   :  { %3189 = vmatprep.subr.bf16.mxu0 %v3741_v60 }
 0x2ba   :  { %3190 = vmatpush3.bf16.msra.mxu0 %v3742_v61 }
 0x2bb   :  { %3191 = vmatprep.subr.bf16.mxu0 %v3743_v62 }
 0x2be   :  { %3192 = vmatpush3.bf16.msra.mxu0 %v3744_v63 }
 0x374   :  { %v4760_v14 = vpop.f32.mrb[8].mxu0 }
 0x375   :  { %v3261_v16 = vpop.f32.mrb[9].mxu0 }
 0x376   :  { %v2143_v17 = vpop.f32.mrb[8].mxu1 }
 0x377   :  { %v2144_v20 = vadd.f32 %v2143_v17, %v2077_v13  ;;  %v2145_v21 = vpop.f32.mrb[9].mxu1  ;;  %v3748_v13 = vld [vmem:[%s5016_s16 + $0x4] ss:$8 sps:$4 sm:$0xff]   ;;  %v2447_v17 = vpop.permute.xlu0 %2446 }
 0x378   :  { %v2146_v22 = vadd.f32 %v2145_v21, %v2081_v15  ;;  %v2147_v23 = vpop.f32.mrb[10].mxu1  ;;  %v3751_v15 = vld [vmem:[%s5016_s16 + $0x14] ss:$8 sps:$4 sm:$0xff]   ;;  %2631 = vmatprep.subr.bf16.mxu0 %v3748_v13  ;;  %v3754_v21 = vld [vmem:[%s5016_s16 + $0x24] ss:$8 sps:$4 sm:$0xff]  }
 0x379   :  { %3780 = vtanh.f32 %v2144_v20  ;;  %v2148_v25 = vpop.f32.mrb[11].mxu1  ;;  %v3749_v20 = vld [vmem:[%s5016_s16 + $0x10] ss:$8 sps:$4 sm:$0xff]   ;;  %v2683_v13 = vld [vmem:[%s5017_s18 + $0x48] sm:$0xff] }
 0x37a   :  { %3782 = vtanh.f32 %v2146_v22 }
 0x383   :  { %v3781_v26 = vpop.eup %3780 }
 0x384   :  { %v3783_v27 = vpop.eup %3782  ;;  %v2184_v29 = vpack.c.bf16 %v3781_v26, %v3781_v26  ;;  %v3752_v26 = vld [vmem:[%s5016_s16 + $0x20] ss:$8 sps:$4 sm:$0xff]  }
 0x385   :  { %v2185_v28 = vpack.c.bf16 %v3783_v27, %v3783_v27  ;;  %v3757_v27 = vld [vmem:[%s5016_s16 + $0x34] ss:$8 sps:$4 sm:$0xff]  }
 0x387   :  { %2321 = vmatprep.mubr.bf16.mxu0 %v2185_v28 }
 0x388   :  { %2322 = vmatmul.mubr.bf16.vlgmr.msra.gmra.mrb[12].mxu0 %v2184_v29  ;;  %v3755_v29 = vld [vmem:[%s5016_s16 + $0x30] ss:$8 sps:$4 sm:$0xff]  }
 0x389   :  { %2663 = vmatprep.mubr.bf16.mxu0 %v3820_v18  ;;  %v2341_v18 = vld [vmem:[%s5010_s12 + $0x58] sm:$0xff]  ;;  %2632 = vmatpush1.bf16.msra.mxu0 %v3746_v12  ;;  %v2682_v12 = vld [vmem:[%s5017_s18 + $0x40] sm:$0xff] }
 0x38a   :  { %v3322_v34 = vpack.c.bf16 %v2341_v18, %v2340_v33  ;;  %2633 = vmatprep.subr.bf16.mxu0 %v3751_v15  ;;  %v3763_v33 = vld [vmem:[%s5016_s16 + $0x54] ss:$8 sps:$4 sm:$0xff]   ;;  %v3761_v18 = vld [vmem:[%s5016_s16 + $0x50] ss:$8 sps:$4 sm:$0xff]   ;;  %v3348_v15 = vpack.c.bf16 %v2683_v13, %v2682_v12 }
 0x38c   :  { %3323 = vmatpush3.bf16.msra.mxu1 %v3322_v34  ;;  %v3766_v34 = vld [vmem:[%s5016_s16 + $0x64] ss:$8 sps:$4 sm:$0xff]  }
 0x38d   :  { %3324 = vmatprep.subr.bf16.mxu1 %v3821_v19  ;;  %2634 = vmatpush1.bf16.msra.mxu0 %v3749_v20 }
 0x38e   :  { %2635 = vmatprep.subr.bf16.mxu0 %v3754_v21  ;;  %v2684_v21 = vld [vmem:[%s5017_s18 + $0x50] sm:$0xff] }
 0x390   :  { %3326 = vmatpush3.bf16.msra.mxu1 %v3325_v37  ;;  %v3767_v37 = vld [vmem:[%s5016_s16 + $0x70] ss:$8 sps:$4 sm:$0xff]  }
 0x391   :  { %3327 = vmatprep.subr.bf16.mxu1 %v3821_v19  ;;  %2636 = vmatpush1.bf16.msra.mxu0 %v3752_v26  ;;  %v2703_v26 = vld [vmem:[%s5017_s18 + $0xe8] sm:$0xff] }
 0x392   :  { %2637 = vmatprep.subr.bf16.mxu0 %v3757_v27  ;;  %v2686_v27 = vld [vmem:[%s5017_s18 + $0x60] sm:$0xff] }
 0x394   :  { %3329 = vmatpush3.bf16.msra.mxu1 %v3328_v40  ;;  %v2674_v40 = vld [vmem:[%s5017_s18] sm:$0xff] }
 0x395   :  { %3297 = vmatprep.subr.bf16.mxu1 %v3823_v24  ;;  %2638 = vmatpush1.bf16.msra.mxu0 %v3755_v29  ;;  %v2687_v29 = vld [vmem:[%s5017_s18 + $0x68] sm:$0xff] }
 0x396   :  { %2639 = vmatprep.subr.bf16.mxu0 %v3760_v31  ;;  %v2705_v31 = vld [vmem:[%s5017_s18 + $0xf8] sm:$0xff] }
 0x399   :  { %2640 = vmatpush1.bf16.msra.mxu0 %v3758_v32  ;;  %v3356_v32 = vpack.c.bf16 %v2687_v29, %v2686_v27 }
 0x39a   :  { %2641 = vmatprep.subr.bf16.mxu0 %v3763_v33 }
 0x39d   :  { %2642 = vmatpush1.bf16.msra.mxu0 %v3761_v18  ;;  %v2688_v18 = vld [vmem:[%s5017_s18 + $0x70] sm:$0xff] }
 0x39e   :  { %2643 = vmatprep.subr.bf16.mxu0 %v3766_v34  ;;  %v2689_v34 = vld [vmem:[%s5017_s18 + $0x78] sm:$0xff] }
 0x3a1   :  { %2644 = vmatpush1.bf16.msra.mxu0 %v3764_v35  ;;  %v3360_v35 = vpack.c.bf16 %v2689_v34, %v2688_v18 }
 0x3a2   :  { %2645 = vmatprep.subr.bf16.mxu0 %v3769_v36  ;;  %v2539_v36 = vld [vmem:[%s5019_s17] sm:$0x3] }
 0x3a3   :  { %v2548_v38 = vrot.slane %v2539_v36, %v4645_v56 }
 0x3a5   :  { %2646 = vmatpush1.bf16.msra.mxu0 %v3767_v37  ;;  %v2544_v37 = vrot.slane %v2539_v36, %v4640_v53 }
 0x45b   :  { %v3193_v42 = vpop.f32.mrb[12].mxu0 }
 0x45c   :  { %v3194_v44 = vpop.f32.mrb[13].mxu0 }
 0x45d   :  { %v3195_v45 = vadd.f32 %v3194_v44, %v3193_v42  ;;  %v3196_v46 = vpop.f32.mrb[14].mxu0  ;;  %v2675_v42 = vld [vmem:[%s5017_s18 + $0x8] sm:$0xff]  ;;  %v2693_v44 = vld [vmem:[%s5017_s18 + $0x98] sm:$0xff] }
 0x45e   :  { %v3197_v47 = vpop.f32.mrb[15].mxu0 }
 0x45f   :  { %v2324_v48 = vadd.f32 %v3195_v45, %v3091_v43  ;;  %v2692_v43 = vld [vmem:[%s5017_s18 + $0x90] sm:$0xff]  ;;  %v3332_v45 = vpack.c.bf16 %v2675_v42, %v2674_v40 }
 0x460   :  { %v3334_v46 = vpack.c.bf16 %v2693_v44, %v2692_v43  ;;  %v2676_v47 = vld [vmem:[%s5017_s18 + $0x10] sm:$0xff] }
 0x461   :  { %3784 = vtanh.f32 %v2324_v48  ;;  %v2677_v48 = vld [vmem:[%s5017_s18 + $0x18] sm:$0xff] }
 0x46b   :  { %v3785_v19 = vpop.eup %3784 }
 0x46c   :  { %3295 = vmatmul.mubr.f32.vlgmr.msra.gmra.mrb[12].mxu1 %v3785_v19  ;;  %v2694_v19 = vld [vmem:[%s5017_s18 + $0xa0] sm:$0xff] }
 0x46d   :  { %3299 = vmatprep.mubr.msk.bf16.mxu1 %vm3822_vm1, %v3823_v24  ;;  %3298 = vmatpush3.bf16.msra.mxu1 %v2479_v50  ;;  %v3336_v50 = vpack.c.bf16 %v2677_v48, %v2676_v47  ;;  %v3082_v47 = vld [vmem:[%s5020_s7] ss:$0 sm:$0xff] }
 0x46e   :  { %3331 = vmatprep.subr.bf16.mxu1 %v3330_v41  ;;  %v4970_v53 = vadd.f32 %v3082_v47, %v4760_v14 }
 0x470   :  { %v2051_v56 = vand.u32 2147483647, %v4970_v53 }
 0x472   :  { %v2052_v48 = vsub.f32 0.0, %v2051_v56 }
 0x53f   :  { %v2419_v52 = vpop.f32.mrb[12].mxu1 }
 0x540   :  { %v4806_v54 = vadd.f32 %v3108_v51, %v2419_v52  ;;  %v3296_v55 = vpop.f32.mrb[13].mxu1  ;;  %v3338_v51 = vpack.c.bf16 %v2695_v49, %v2694_v19  ;;  %v2678_v52 = vld [vmem:[%s5017_s18 + $0x20] sm:$0xff]  ;;  %v2053_v19 = vmul.f32 1.442695, %v2052_v48 }
 0x541   :  { %v2679_v55 = vld [vmem:[%s5017_s18 + $0x28] sm:$0xff] }
 0x542   :  { %2451 = vrot.lane.b32.xlu0 %v4806_v54, %s3824_s3  ;;  %v2424_v57 = vand.u32 2147483647, %v4806_v54  ;;  %v2423_v5 = vmax.f32 %v4806_v54, 0.0 }
 0x544   :  { %v2425_v58 = vsub.f32 0.0, %v2424_v57  ;;  %v2696_v57 = vld [vmem:[%s5017_s18 + $0xb0] sm:$0xff] }
 0x546   :  { %v2426_v59 = vmul.f32 1.442695, %v2425_v58  ;;  %v2697_v58 = vld [vmem:[%s5017_s18 + $0xb8] sm:$0xff] }
 0x548   :  { %3786 = vpow2.f32 %v2426_v59  ;;  %v3340_v59 = vpack.c.bf16 %v2679_v55, %v2678_v52 }
 0x552   :  { %v3787_v60 = vpop.eup %3786 }
 0x553   :  { %v2428_v61 = vadd.f32 1.0, %v3787_v60  ;;  %v2431_v62 = vmul.f32 -0.5, %v3787_v60  ;;  %v2434_v1 = vand.u32 2147483647, %v3787_v60 }
 0x555   :  { %3788 = vlog2.f32 %v2428_v61  ;;  %v2432_v0 = vadd.f32 1.0, %v2431_v62  ;;  %vm2435_vm6 = vcmp.lt.f32.partialorder %v2434_v1, 0.0004427343  ;;  %v2680_v61 = vld [vmem:[%s5017_s18 + $0x30] sm:$0xff]  ;;  %v2681_v62 = vld [vmem:[%s5017_s18 + $0x38] sm:$0xff] }
 0x557   :  { %v2433_v3 = vmul.f32 %v3787_v60, %v2432_v0  ;;  %v3342_v60 = vpack.c.bf16 %v2697_v58, %v2696_v57  ;;  %v3109_v0 = vld [vmem:[%s5018_s15] ss:$0 sm:$0xff] }
 0x55f   :  { %v3789_v63 = vpop.eup %3788 }
 0x560   :  { %v2430_v2 = vmul.f32 0.6931472, %v3789_v63  ;;  %v3344_v63 = vpack.c.bf16 %v2681_v62, %v2680_v61 }
 0x562   :  { %v2436_v4 = vsel %vm2435_vm6, %v2433_v3, %v2430_v2 }
 0x563   :  { %v2437_v6 = vadd.f32 %v2436_v4, %v2423_v5 }
 0x565   :  { %v2438_v7 = vadd.f32 1e-08, %v2437_v6 }
 0x567   :  { %3790 = vlog2.f32 %v2438_v7 }
 0x571   :  { %v3791_v8 = vpop.eup %3790 }
 0x572   :  { %v4811_v9 = vmul.f32 0.6931472, %v3791_v8  ;;  %v2698_v8 = vld [vmem:[%s5017_s18 + $0xc0] sm:$0xff] }
 0x574   :  { %v2441_v10 = vmul.f32 0.5, %v4811_v9 }
 0x576   :  { %v2442_v11 = vmul.f32 1.442695, %v2441_v10  ;;  %v2699_v10 = vld [vmem:[%s5017_s18 + $0xc8] sm:$0xff] }
 0x578   :  { %3792 = vpow2.f32 %v2442_v11  ;;  %v3346_v11 = vpack.c.bf16 %v2699_v10, %v2698_v8 }
 0x582   :  { %v3793_v16 = vpop.eup %3792 }
 0x583   :  { %v2449_v22 = vmul.f32 %v3793_v16, %v2447_v17  ;;  %v2700_v16 = vld [vmem:[%s5017_s18 + $0xd0] sm:$0xff]  ;;  %v2701_v17 = vld [vmem:[%s5017_s18 + $0xd8] sm:$0xff] }
 0x584   :  { %v3350_v20 = vpack.c.bf16 %v2701_v17, %v2700_v16 }
 0x5b4   :  { %v2452_v23 = vpop.permute.xlu0 %2451 }
 0x5b5   :  { %v2454_v25 = vadd.f32 %v2452_v23, %v2449_v22  ;;  %v2685_v22 = vld [vmem:[%s5017_s18 + $0x58] sm:$0xff] }
 0x5b6   :  { %v3352_v23 = vpack.c.bf16 %v2685_v22, %v2684_v21 }
 0x5b7   :  { %v2457_v28 = vpack.c.bf16 %v2454_v25, %v2454_v25  ;;  %v2702_v25 = vld [vmem:[%s5017_s18 + $0xe0] sm:$0xff] }
 0x5b9   :  { %2466 = vrot.lane.b32.xlu1 %v2457_v28, %s3825_s24  ;;  %v3354_v28 = vpack.c.bf16 %v2703_v26, %v2702_v25 }
 0x62b   :  { %v2467_v30 = vpop.permute.xlu1 %2466 }
 0x62c   :  { %3300 = vmatmul.mubr.msk.bf16.vlgmr.msra.gmra.mrb[16].mxu1 %vm2473_vm7, %v2467_v30  ;;  %v2704_v30 = vld [vmem:[%s5017_s18 + $0xf0] sm:$0xff] }
 0x62d   :  { %3333 = vmatpush3.bf16.msra.mxu1 %v3332_v45  ;;  %v3358_v33 = vpack.c.bf16 %v2705_v31, %v2704_v30 }
 0x62e   :  { %3335 = vmatprep.subr.bf16.mxu1 %v3334_v46 }
 0x631   :  { %3337 = vmatpush3.bf16.msra.mxu1 %v3336_v50  ;;  %v3128_v50 = vld [vmem:[%s5021_s19] ss:$0 sm:$0xff] }
 0x632   :  { %3339 = vmatprep.subr.bf16.mxu1 %v3338_v51 }
 0x635   :  { %3341 = vmatpush3.bf16.msra.mxu1 %v3340_v59 }
 0x636   :  { %3343 = vmatprep.subr.bf16.mxu1 %v3342_v60 }
 0x639   :  { %3345 = vmatpush3.bf16.msra.mxu1 %v3344_v63 }
 0x63a   :  { %3347 = vmatprep.subr.bf16.mxu1 %v3346_v11 }
 0x63d   :  { %3349 = vmatpush3.bf16.msra.mxu1 %v3348_v15 }
 0x63e   :  { %3351 = vmatprep.subr.bf16.mxu1 %v3350_v20 }
 0x641   :  { %3353 = vmatpush3.bf16.msra.mxu1 %v3352_v23 }
 0x642   :  { %3355 = vmatprep.subr.bf16.mxu1 %v3354_v28 }
 0x645   :  { %3357 = vmatpush3.bf16.msra.mxu1 %v3356_v32 }
 0x646   :  { %3359 = vmatprep.subr.bf16.mxu1 %v3358_v33 }
 0x649   :  { %3361 = vmatpush3.bf16.msra.mxu1 %v3360_v35 }
 0x6ff   :  { %v2515_v1 = vpop.f32.mrb[16].mxu1 }
 0x700   :  { %v2516_v2 = vadd.f32 %v3109_v0, %v2515_v1  ;;  %v3301_v3 = vpop.f32.mrb[17].mxu1 }
 0x701   :  { %v2518_v4 = vpop.f32.mrb[18].mxu1 }
 0x702   :  { %3794 = vtanh.f32 %v2516_v2  ;;  %v3302_v5 = vpop.f32.mrb[19].mxu1 }
 0x70c   :  { %v3795_v6 = vpop.eup %3794 }
 0x70d   :  { %v2538_v7 = vpack.c.bf16 %v3795_v6, %v3795_v6 }
 0x70f   :  { %2664 = vmatmul.mubr.bf16.vlgmr.msra.gmra.mrb[16].mxu0 %v2538_v7  ;;  %v2050_v7 = vmax.f32 %v4970_v53, 0.0 }
 0x7e2   :  { %v2665_v39 = vpop.f32.mrb[16].mxu0 }
 0x7e3   :  { %v2666_v40 = vadd.f32 %v2665_v39, %v2544_v37  ;;  %v2667_v41 = vpop.f32.mrb[17].mxu0 }
 0x7e4   :  { %v2668_v42 = vadd.f32 %v2667_v41, %v2548_v38  ;;  %v2669_v43 = vpop.f32.mrb[18].mxu0 }
 0x7e5   :  { %v2670_v44 = vpop.f32.mrb[19].mxu0 }
 0x7e6   :  { %3796 = vtanh.f32 %v2668_v42 }
 0x7e7   :  { %3798 = vtanh.f32 %v2666_v40 }
 0x7e8   :  { %3800 = vpow2.f32 %v2053_v19 }
 0x7f0   :  { %v3797_v45 = vpop.eup %3796 }
 0x7f1   :  { %v3799_v46 = vpop.eup %3798  ;;  %2777 = vmatprep.mubr.f32.mxu1 %v3797_v45 }
 0x7f2   :  { %2778 = vmatmul.mubr.f32.vlgmr.msra.gmra.mrb[14].mxu1 %v3799_v46  ;;  %v3801_v55 = vpop.eup %3800 }
 0x7f3   :  { %v2055_v59 = vadd.f32 1.0, %v3801_v55  ;;  %v2058_v61 = vmul.f32 -0.5, %v3801_v55  ;;  %v2061_v1 = vand.u32 2147483647, %v3801_v55 }
 0x7f5   :  { %3802 = vlog2.f32 %v2055_v59  ;;  %v2059_v0 = vadd.f32 1.0, %v2058_v61  ;;  %vm2062_vm8 = vcmp.lt.f32.partialorder %v2061_v1, 0.0004427343 }
 0x7f7   :  { %v2060_v4 = vmul.f32 %v3801_v55, %v2059_v0 }
 0x7ff   :  { %v3803_v62 = vpop.eup %3802 }
 0x800   :  { %v2057_v3 = vmul.f32 0.6931472, %v3803_v62 }
 0x802   :  { %v2063_v5 = vsel %vm2062_vm8, %v2060_v4, %v2057_v3 }
 0x803   :  { %v2064_v8 = vadd.f32 %v2063_v5, %v2050_v7 }
 0x805   :  { %v2065_v13 = vadd.f32 1e-08, %v2064_v8 }
 0x8c5   :  { %v3250_v49 = vpop.f32.mrb[14].mxu1 }
 0x8c6   :  { %v3251_v51 = vpop.f32.mrb[15].mxu1 }
 0x8c7   :  { %v3252_v52 = vadd.f32 %v3251_v51, %v3250_v49 }
 0x8c9   :  { %v4976_v57 = vadd.f32 %v3252_v52, %v3128_v50 }
 0x8cb   :  { %v2784_v58 = vand.u32 2147483647, %v4976_v57  ;;  %v2783_v17 = vmax.f32 %v4976_v57, 0.0 }
 0x8cd   :  { %v2785_v14 = vsub.f32 0.0, %v2784_v58 }
 0x8cf   :  { %v2786_v60 = vmul.f32 1.442695, %v2785_v14 }
 0x8d1   :  { %3804 = vpow2.f32 %v2786_v60 }
 0x8db   :  { %v3805_v63 = vpop.eup %3804 }
 0x8dc   :  { %v2788_v2 = vadd.f32 1.0, %v3805_v63  ;;  %v2791_v6 = vmul.f32 -0.5, %v3805_v63  ;;  %v2794_v11 = vand.u32 2147483647, %v3805_v63 }
 0x8de   :  { %3806 = vlog2.f32 %v2788_v2  ;;  %v2792_v10 = vadd.f32 1.0, %v2791_v6  ;;  %vm2795_vm9 = vcmp.lt.f32.partialorder %v2794_v11, 0.0004427343 }
 0x8df   :  { %3808 = vlog2.f32 %v2065_v13 }
 0x8e0   :  { %v2793_v16 = vmul.f32 %v3805_v63, %v2792_v10 }
 0x8e8   :  { %v3807_v12 = vpop.eup %3806 }
 0x8e9   :  { %v2790_v15 = vmul.f32 0.6931472, %v3807_v12  ;;  %v3809_v23 = vpop.eup %3808 }
 0x8ea   :  { %v2067_v25 = vmul.f32 0.6931472, %v3809_v23 }
 0x8eb   :  { %v2796_v20 = vsel %vm2795_vm9, %v2793_v16, %v2790_v15 }
 0x8ec   :  { %v2797_v21 = vadd.f32 %v2796_v20, %v2783_v17  ;;  %v2801_v28 = vsub.f32 0.0, %v2067_v25 }
 0x8ee   :  { %v2798_v22 = vadd.f32 1e-08, %v2797_v21 }
 0x8f0   :  { %3810 = vlog2.f32 %v2798_v22 }
 0x8fa   :  { %v3811_v26 = vpop.eup %3810 }
 0x8fb   :  { %v2800_v27 = vmul.f32 0.6931472, %v3811_v26 }
 0x8fd   :  { %v2802_v29 = vsub.f32 0.0, %v2800_v27 }
 0x8ff   :  { %v2803_v30 = vmax.f32 %v2801_v28, %v2802_v29 }
 0x901   :  { %v2804_v31 = vsub.f32 %v2801_v28, %v2803_v30  ;;  %v2807_v32 = vsub.f32 %v2802_v29, %v2803_v30 }
 0x903   :  { %v2805_v33 = vmul.f32 1.442695, %v2804_v31  ;;  %v2808_v18 = vmul.f32 1.442695, %v2807_v32 }
 0x905   :  { %3812 = vpow2.f32 %v2805_v33 }
 0x906   :  { %3814 = vpow2.f32 %v2808_v18 }
 0x90f   :  { %v3813_v34 = vpop.eup %3812 }
 0x910   :  { %v3815_v35 = vpop.eup %3814  ;;  %2813 = vrot.lane.b32.xlu1 %v3813_v34, %s3826_s14 }
 0x911   :  { %v2810_v36 = vadd.f32 %v3815_v35, %v3813_v34  ;;  %2818 = vrot.lane.b32.xlu0 %v3815_v35, %s3826_s14 }
 0x913   :  { %3816 = vlog2.f32 %v2810_v36 }
 0x914   :  { %3818 = vrcp.f32 %v2810_v36 }
 0x915   :  { %2836 = vrot.lane.b32.xlu0 %v4806_v54, %s3827_s28 }
 0x91d   :  { %v3817_v37 = vpop.eup %3816 }
 0x91e   :  { %v3819_v38 = vpop.eup %3818  ;;  %v2829_v39 = vmul.f32 0.6931472, %v3817_v37 }
 0x91f   :  { %2824 = vrot.lane.b32.xlu1 %v3819_v38, %s3826_s14 }
 0x920   :  { %v2830_v40 = vadd.f32 %v2829_v39, %v2803_v30 }
 0x922   :  { %v2831_v47 = vsub.f32 0.0, %v2830_v40 }
 0x923   :  { %2842 = vrot.lane.b32.xlu1 %v4811_v9, %s3827_s28 }
 0x982   :  { %v2814_v24 = vpop.permute.xlu1 %2813 }
 0x983   :  { %v2819_v41 = vpop.permute.xlu0 %2818  ;;  %v2816_v43 = vmul.f32 %v2814_v24, %v4970_v53 }
 0x984   :  { %v2821_v42 = vmul.f32 %v2819_v41, %v4976_v57 }
 0x986   :  { %v2822_v44 = vadd.f32 %v2821_v42, %v2816_v43 }
 0x987   :  { %v2837_v54 = vpop.permute.xlu0 %2836 }
 0x991   :  { %v2825_v45 = vpop.permute.xlu1 %2824 }
 0x992   :  { %v2827_v46 = vmul.f32 %v2825_v45, %v2822_v44 }
 0x994   :  { %2833 = vst.msk [vmem:[%s5022_s20] sm:$0xff] %vm1972_vm4, %v2827_v46 }
 0x995   :  { %2835 = vst.msk [vmem:[%s5022_s20] sm:$0xff] %vm2834_vm10, %v2831_v47  ;;  %v2843_v9 = vpop.permute.xlu1 %2842 }
 0x996   :  { %2840 = vst.msk [vmem:[%s5022_s20] sm:$0xff] %vm2839_vm11, %v2837_v54 }
 0x997   :  { %2846 = vst.msk [vmem:[%s5022_s20] sm:$0xff] %vm2845_vm12, %v2843_v9 }

</bundles_post_ra>
